<compile_context>
chip_gen: v7x
topology: tpu7x:2x2x1
jax: 0.10.0
libtpu: 0.0.40
codegen_flags: <defaults>
</compile_context>

<pallas_src>
import functools

import jax
import jax.numpy as jnp
from jax.experimental import pallas as pl
from jax.experimental.pallas import tpu as pltpu


def _round_up(x, m):
    return ((x + m - 1) // m) * m


# ----------------------------------------------------------------------------
# Fused kernel: all LSTM layers + final Linear in a single launch.
# Gate order inside the kernel is [i, f, o, g] (repacked offline from PyTorch).
# ----------------------------------------------------------------------------
def _fused_lstm_fc_kernel(*refs, n_layers, hidden_dim, seq_len, batch_pad):
    H, T, Bp = hidden_dim, seq_len, batch_pad

    x_ref, h0_ref, c0_ref = refs[0], refs[1], refs[2]
    layer_refs = refs[3:3 + 3 * n_layers]
    fc_w_ref = refs[3 + 3 * n_layers]      # (H, O_pad)  pre-transposed, lane-padded
    fc_b_ref = refs[4 + 3 * n_layers]      # (1, O_pad)
    out_ref = refs[5 + 3 * n_layers]       # (T*Bp, O_pad)
    hN_ref = refs[6 + 3 * n_layers]        # (L, Bp, H)
    cN_ref = refs[7 + 3 * n_layers]        # (L, Bp, H)
    xproj_ref = refs[8 + 3 * n_layers]     # scratch (T*Bp, 4H)
    act_ref = refs[9 + 3 * n_layers]       # scratch (T*Bp, H)

    for l in range(n_layers):
        w_ihT = layer_refs[3 * l][...]       # (in_sz, 4H)
        w_hhT = layer_refs[3 * l + 1][...]   # (H, 4H)
        bias = layer_refs[3 * l + 2][...]    # (1, 4H)  (b_ih + b_hh, repacked)

        # Layer input: original x for layer 0, previous layer's activations after.
        layer_in = x_ref[...] if l == 0 else act_ref[...]   # (T*Bp, in_sz)

        # Hoisted input projection: one MXU matmul covering every timestep.
        xproj_ref[...] = (
            jnp.dot(layer_in, w_ihT, preferred_element_type=jnp.float32) + bias)

        h = h0_ref[l]        # (Bp, H)
        c = c0_ref[l]        # (Bp, H)

        # Sequential recurrence over time (static T -> fully unrolled, static
        # sublane-aligned slices of the flat buffers).
        for t in range(T):
            r0 = t * Bp
            gates = (xproj_ref[r0:r0 + Bp, :]
                     + jnp.dot(h, w_hhT, preferred_element_type=jnp.float32))
            sig = jax.nn.sigmoid(gates[:, :3 * H])   # one contiguous sigmoid slab
            i_g = sig[:, 0 * H:1 * H]
            f_g = sig[:, 1 * H:2 * H]
            o_g = sig[:, 2 * H:3 * H]
            g_g = jnp.tanh(gates[:, 3 * H:4 * H])    # one contiguous tanh slab
            c = f_g * c + i_g * g_g
            h = o_g * jnp.tanh(c)
            act_ref[r0:r0 + Bp, :] = h

        hN_ref[l] = h
        cN_ref[l] = c

    # Fused final Linear over all T*Bp rows; lane-dense (padded) output write.
    out_ref[...] = (jnp.dot(act_ref[...], fc_w_ref[...],
                            preferred_element_type=jnp.float32) + fc_b_ref[...])


# ----------------------------------------------------------------------------
# Wrapper: layout plumbing (transpose / pad / flatten) done at trace time.
# ----------------------------------------------------------------------------
def timeseries_lstm_forward(params, x_bti, hidden):
    """x_bti: (B, T, input_size). hidden: (h0, c0) each (n_layers, B, H).
    Returns (output (B, T, output_size), (hN, cN)) — matches PyTorch eval forward."""
    h0_all, c0_all = hidden
    B, T, I = x_bti.shape
    L = len(params["lstm"])
    H = params["lstm"][0]["w_hhT"].shape[0]
    O = params["fc"]["wT"].shape[1]

    Bp = _round_up(B, 8)            # sublane-aligned padded batch
    O_pad = _round_up(O, 128)       # lane-dense FC output

    # Time-major, batch-padded, flattened input: row index = t*Bp + b.
    x_tbi = jnp.transpose(x_bti.astype(jnp.float32), (1, 0, 2))       # (T, B, I)
    x_tbi = jnp.pad(x_tbi, ((0, 0), (0, Bp - B), (0, 0)))
    x_flat = x_tbi.reshape(T * Bp, I)

    h0 = jnp.pad(h0_all.astype(jnp.float32), ((0, 0), (0, Bp - B), (0, 0)))
    c0 = jnp.pad(c0_all.astype(jnp.float32), ((0, 0), (0, Bp - B), (0, 0)))

    fc_wT = jnp.pad(params["fc"]["wT"], ((0, 0), (0, O_pad - O)))     # (H, O_pad)
    fc_b = jnp.pad(params["fc"]["b"], ((0, O_pad - O),)).reshape(1, O_pad)

    inputs = [x_flat, h0, c0]
    in_specs = [
        pl.BlockSpec((T * Bp, I), lambda i: (0, 0)),
        pl.BlockSpec((L, Bp, H), lambda i: (0, 0, 0)),
        pl.BlockSpec((L, Bp, H), lambda i: (0, 0, 0)),
    ]
    for lp in params["lstm"]:
        in_sz = lp["w_ihT"].shape[0]
        inputs += [lp["w_ihT"], lp["w_hhT"], lp["b"]]
        in_specs += [
            pl.BlockSpec((in_sz, 4 * H), lambda i: (0, 0)),
            pl.BlockSpec((H, 4 * H), lambda i: (0, 0)),
            pl.BlockSpec((1, 4 * H), lambda i: (0, 0)),
        ]
    inputs += [fc_wT, fc_b]
    in_specs += [
        pl.BlockSpec((H, O_pad), lambda i: (0, 0)),
        pl.BlockSpec((1, O_pad), lambda i: (0, 0)),
    ]

    out_shapes = (
        jax.ShapeDtypeStruct((T * Bp, O_pad), jnp.float32),   # FC output (padded)
        jax.ShapeDtypeStruct((L, Bp, H), jnp.float32),        # final h
        jax.ShapeDtypeStruct((L, Bp, H), jnp.float32),        # final c
    )
    out_specs = [
        pl.BlockSpec((T * Bp, O_pad), lambda i: (0, 0)),
        pl.BlockSpec((L, Bp, H), lambda i: (0, 0, 0)),
        pl.BlockSpec((L, Bp, H), lambda i: (0, 0, 0)),
    ]

    kernel = functools.partial(_fused_lstm_fc_kernel,
                               n_layers=L, hidden_dim=H,
                               seq_len=T, batch_pad=Bp)

    grid_spec = pltpu.PrefetchScalarGridSpec(
        num_scalar_prefetch=0,
        grid=(1,),
        in_specs=in_specs,
        out_specs=out_specs,
        scratch_shapes=[
            pltpu.VMEM((T * Bp, 4 * H), jnp.float32),   # hoisted x-projection
            pltpu.VMEM((T * Bp, H), jnp.float32),       # inter-layer activations
        ],
    )

    out_pad, hN_pad, cN_pad = pl.pallas_call(
        kernel,
        out_shape=out_shapes,
        grid_spec=grid_spec,
        compiler_params=pltpu.CompilerParams(
            dimension_semantics=("arbitrary",)),
    )(*inputs)

    out = out_pad.reshape(T, Bp, O_pad)[:, :B, :O]     # strip pad
    output = jnp.transpose(out, (1, 0, 2))             # (B, T, O), batch_first
    return output, (hN_pad[:, :B, :], cN_pad[:, :B, :])


# ----------------------------------------------------------------------------
# Parameter handling
# ----------------------------------------------------------------------------
def init_params(key, input_size, output_size, hidden_dim, n_layers):
    """PyTorch-layout params: W_ih (4H,in), W_hh (4H,H), b_ih/b_hh (4H,), gates [i,f,g,o]."""
    H = hidden_dim
    bound = 1.0 / (H ** 0.5)
    params = {"lstm": [], "fc": {}}
    for l in range(n_layers):
        in_sz = input_size if l == 0 else H
        key, k1, k2, k3, k4 = jax.random.split(key, 5)
        params["lstm"].append({
            "w_ih": jax.random.uniform(k1, (4 * H, in_sz), jnp.float32, -bound, bound),
            "w_hh": jax.random.uniform(k2, (4 * H, H), jnp.float32, -bound, bound),
            "b_ih": jax.random.uniform(k3, (4 * H,), jnp.float32, -bound, bound),
            "b_hh": jax.random.uniform(k4, (4 * H,), jnp.float32, -bound, bound),
        })
    key, k5, k6 = jax.random.split(key, 3)
    params["fc"]["w"] = jax.random.uniform(k5, (output_size, H), jnp.float32, -bound, bound)
    params["fc"]["b"] = jax.random.uniform(k6, (output_size,), jnp.float32, -bound, bound)
    return params


def _repack_gates(a):
    """Reorder PyTorch gate blocks [i, f, g, o] -> [i, f, o, g] along axis 0."""
    H = a.shape[0] // 4
    return jnp.concatenate([a[0:2 * H], a[3 * H:4 * H], a[2 * H:3 * H]], axis=0)


def prepare_params(torch_params):
    """One-time (trace-time) repack: transpose weights, reorder gates, pre-sum biases."""
    kp = {"lstm": [], "fc": {}}
    for lp in torch_params["lstm"]:
        w_ihT = _repack_gates(lp["w_ih"]).T                       # (in_sz, 4H)
        w_hhT = _repack_gates(lp["w_hh"]).T                       # (H, 4H)
        b = (_repack_gates(lp["b_ih"]) + _repack_gates(lp["b_hh"])).reshape(1, -1)
        kp["lstm"].append({"w_ihT": jnp.asarray(w_ihT, jnp.float32),
                           "w_hhT": jnp.asarray(w_hhT, jnp.float32),
                           "b": jnp.asarray(b, jnp.float32)})
    kp["fc"]["wT"] = jnp.asarray(torch_params["fc"]["w"].T, jnp.float32)   # (H, O)
    kp["fc"]["b"] = jnp.asarray(torch_params["fc"]["b"], jnp.float32)      # (O,)
    return kp


# ----------------------------------------------------------------------------
# Pure-JAX reference (PyTorch semantics, PyTorch gate order) for correctness
# ----------------------------------------------------------------------------
def reference_forward(torch_params, x_bti, hidden):
    h0_all, c0_all = hidden
    layer_in = x_bti.astype(jnp.float32)
    h_fin, c_fin = [], []
    for l, lp in enumerate(torch_params["lstm"]):
        w_ih, w_hh = lp["w_ih"], lp["w_hh"]
        b = lp["b_ih"] + lp["b_hh"]
        H = w_hh.shape[1]

        def step(carry, x_t, w_ih=w_ih, w_hh=w_hh, b=b, H=H):
            h, c = carry
            g = x_t @ w_ih.T + h @ w_hh.T + b
            i = jax.nn.sigmoid(g[:, 0 * H:1 * H])
            f = jax.nn.sigmoid(g[:, 1 * H:2 * H])
            gg = jnp.tanh(g[:, 2 * H:3 * H])
            o = jax.nn.sigmoid(g[:, 3 * H:4 * H])
            c = f * c + i * gg
            h = o * jnp.tanh(c)
            return (h, c), h

        (hN, cN), outs = jax.lax.scan(step, (h0_all[l], c0_all[l]),
                                      jnp.transpose(layer_in, (1, 0, 2)))
        layer_in = jnp.transpose(outs, (1, 0, 2))
        h_fin.append(hN)
        c_fin.append(cN)
    out = layer_in @ torch_params["fc"]["w"].T + torch_params["fc"]["b"]
    return out, (jnp.stack(h_fin, 0), jnp.stack(c_fin, 0))


if __name__ == "__main__":
    INPUT_SIZE, OUTPUT_SIZE, HIDDEN_DIM, N_LAYERS = 4, 1, 32, 2
    BATCH, SEQ = 2, 8

    key = jax.random.PRNGKey(0)
    key, kp, kx = jax.random.split(key, 3)
    torch_params = init_params(kp, INPUT_SIZE, OUTPUT_SIZE, HIDDEN_DIM, N_LAYERS)
    params = prepare_params(torch_params)

    x = jax.random.normal(kx, (BATCH, SEQ, INPUT_SIZE), jnp.float32)
    h0 = jnp.zeros((N_LAYERS, BATCH, HIDDEN_DIM), jnp.float32)
    c0 = jnp.zeros((N_LAYERS, BATCH, HIDDEN_DIM), jnp.float32)

    fwd = jax.jit(timeseries_lstm_forward)
    output, (hN, cN) = fwd(params, x, (h0, c0))
    jax.block_until_ready((output, hN, cN))

    ref_out, (ref_h, ref_c) = reference_forward(torch_params, x, (h0, c0))
    assert output.shape == (BATCH, SEQ, OUTPUT_SIZE)
    assert hN.shape == (N_LAYERS, BATCH, HIDDEN_DIM)
    assert cN.shape == (N_LAYERS, BATCH, HIDDEN_DIM)
    assert jnp.allclose(output, ref_out, atol=1e-4, rtol=1e-4)
    assert jnp.allclose(hN, ref_h, atol=1e-4, rtol=1e-4)
    assert jnp.allclose(cN, ref_c, atol=1e-4, rtol=1e-4)

    print("KERNEL_OK")
</pallas_src>

<mosaic_0001>
module attributes {stable_mosaic.version = 11 : i64} {
  func.func @_fused_lstm_fc_kernel(%arg0: i32, %arg1: memref<64x4xf32, #tpu.memory_space<vmem>>, %arg2: memref<2x8x32xf32, #tpu.memory_space<vmem>>, %arg3: memref<2x8x32xf32, #tpu.memory_space<vmem>>, %arg4: memref<4x128xf32, #tpu.memory_space<vmem>>, %arg5: memref<32x128xf32, #tpu.memory_space<vmem>>, %arg6: memref<1x128xf32, #tpu.memory_space<vmem>>, %arg7: memref<32x128xf32, #tpu.memory_space<vmem>>, %arg8: memref<32x128xf32, #tpu.memory_space<vmem>>, %arg9: memref<1x128xf32, #tpu.memory_space<vmem>>, %arg10: memref<32x128xf32, #tpu.memory_space<vmem>>, %arg11: memref<1x128xf32, #tpu.memory_space<vmem>>, %arg12: memref<64x128xf32, #tpu.memory_space<vmem>>, %arg13: memref<2x8x32xf32, #tpu.memory_space<vmem>>, %arg14: memref<2x8x32xf32, #tpu.memory_space<vmem>>, %arg15: memref<64x128xf32, #tpu.memory_space<vmem>>, %arg16: memref<64x32xf32, #tpu.memory_space<vmem>>) attributes {dimension_semantics = [#tpu.dimension_semantics<arbitrary>], iteration_bounds = array<i64: 1>, scalar_prefetch = 0 : i64, scratch_operands = 2 : i64, tpu.core_type = #tpu.core_type<tc>, window_params = [{pipeline_mode = #tpu.pipeline_mode<synchronous>, transform_indices = @transform_0, window_bounds = array<i64: 64, 4>}, {pipeline_mode = #tpu.pipeline_mode<synchronous>, transform_indices = @transform_1, window_bounds = array<i64: 2, 8, 32>}, {pipeline_mode = #tpu.pipeline_mode<synchronous>, transform_indices = @transform_2, window_bounds = array<i64: 2, 8, 32>}, {pipeline_mode = #tpu.pipeline_mode<synchronous>, transform_indices = @transform_3, window_bounds = array<i64: 4, 128>}, {pipeline_mode = #tpu.pipeline_mode<synchronous>, transform_indices = @transform_4, window_bounds = array<i64: 32, 128>}, {pipeline_mode = #tpu.pipeline_mode<synchronous>, transform_indices = @transform_5, window_bounds = array<i64: 1, 128>}, {pipeline_mode = #tpu.pipeline_mode<synchronous>, transform_indices = @transform_6, window_bounds = array<i64: 32, 128>}, {pipeline_mode = #tpu.pipeline_mode<synchronous>, transform_indices = @transform_7, window_bounds = array<i64: 32, 128>}, {pipeline_mode = #tpu.pipeline_mode<synchronous>, transform_indices = @transform_8, window_bounds = array<i64: 1, 128>}, {pipeline_mode = #tpu.pipeline_mode<synchronous>, transform_indices = @transform_9, window_bounds = array<i64: 32, 128>}, {pipeline_mode = #tpu.pipeline_mode<synchronous>, transform_indices = @transform_10, window_bounds = array<i64: 1, 128>}, {pipeline_mode = #tpu.pipeline_mode<synchronous>, transform_indices = @transform_11, window_bounds = array<i64: 64, 128>}, {pipeline_mode = #tpu.pipeline_mode<synchronous>, transform_indices = @transform_12, window_bounds = array<i64: 2, 8, 32>}, {pipeline_mode = #tpu.pipeline_mode<synchronous>, transform_indices = @transform_13, window_bounds = array<i64: 2, 8, 32>}]} {
    %c0 = arith.constant 0 : index
    %c0_0 = arith.constant 0 : index
    %0 = vector.load %arg4[%c0, %c0_0] : memref<4x128xf32, #tpu.memory_space<vmem>>, vector<4x128xf32>
    %c0_1 = arith.constant 0 : index
    %c0_2 = arith.constant 0 : index
    %1 = vector.load %arg5[%c0_1, %c0_2] : memref<32x128xf32, #tpu.memory_space<vmem>>, vector<32x128xf32>
    %c0_3 = arith.constant 0 : index
    %c0_4 = arith.constant 0 : index
    %2 = vector.load %arg6[%c0_3, %c0_4] : memref<1x128xf32, #tpu.memory_space<vmem>>, vector<1x128xf32>
    %c0_5 = arith.constant 0 : index
    %c0_6 = arith.constant 0 : index
    %3 = vector.load %arg1[%c0_5, %c0_6] : memref<64x4xf32, #tpu.memory_space<vmem>>, vector<64x4xf32>
    %cst = arith.constant dense<0.000000e+00> : vector<64x128xf32>
    %4 = tpu.matmul %3, %0, %cst {dimension_numbers = #tpu.dot_dimension_numbers<[1], [0], [0], [1], [0, 0, 1, 1], [], []>} : vector<64x4xf32>, vector<4x128xf32>, vector<64x128xf32> -> vector<64x128xf32>
    %5 = vector.broadcast %2 : vector<1x128xf32> to vector<64x128xf32>
    %6 = arith.addf %4, %5 : vector<64x128xf32>
    %c0_7 = arith.constant 0 : index
    %c0_8 = arith.constant 0 : index
    %7 = vector.load %arg15[%c0_7, %c0_8] : memref<64x128xf32, #tpu.memory_space<vmem>>, vector<64x128xf32>
    tpu.vector_store %arg15[%c0_7, %c0_8], %6 {strides = array<i32>} : memref<64x128xf32, #tpu.memory_space<vmem>>, vector<64x128xf32>,
    %c0_9 = arith.constant 0 : index
    %c0_10 = arith.constant 0 : index
    %c0_11 = arith.constant 0 : index
    %8 = vector.load %arg2[%c0_9, %c0_10, %c0_11] : memref<2x8x32xf32, #tpu.memory_space<vmem>>, vector<1x8x32xf32>
    %9 = vector.shape_cast %8 : vector<1x8x32xf32> to vector<8x32xf32>
    %c0_12 = arith.constant 0 : index
    %c0_13 = arith.constant 0 : index
    %c0_14 = arith.constant 0 : index
    %10 = vector.load %arg3[%c0_12, %c0_13, %c0_14] : memref<2x8x32xf32, #tpu.memory_space<vmem>>, vector<1x8x32xf32>
    %11 = vector.shape_cast %10 : vector<1x8x32xf32> to vector<8x32xf32>
    %c0_15 = arith.constant 0 : index
    %c0_16 = arith.constant 0 : index
    %12 = vector.load %arg15[%c0_15, %c0_16] : memref<64x128xf32, #tpu.memory_space<vmem>>, vector<8x128xf32>
    %cst_17 = arith.constant dense<0.000000e+00> : vector<8x128xf32>
    %13 = tpu.matmul %9, %1, %cst_17 {dimension_numbers = #tpu.dot_dimension_numbers<[1], [0], [0], [1], [0, 0, 1, 1], [], []>} : vector<8x32xf32>, vector<32x128xf32>, vector<8x128xf32> -> vector<8x128xf32>
    %14 = arith.addf %12, %13 : vector<8x128xf32>
    %15 = vector.extract_strided_slice %14 {offsets = [0, 0], sizes = [8, 96], strides = [1, 1]} : vector<8x128xf32> to vector<8x96xf32>
    %16 = arith.negf %15 : vector<8x96xf32>
    %17 = math.exp %16 : vector<8x96xf32>
    %cst_18 = arith.constant 1.000000e+00 : f32
    %18 = vector.broadcast %cst_18 : f32 to vector<8x96xf32>
    %19 = arith.addf %18, %17 : vector<8x96xf32>
    %20 = arith.divf %18, %19 : vector<8x96xf32>
    %21 = vector.extract_strided_slice %20 {offsets = [0, 0], sizes = [8, 32], strides = [1, 1]} : vector<8x96xf32> to vector<8x32xf32>
    %22 = vector.extract_strided_slice %20 {offsets = [0, 32], sizes = [8, 32], strides = [1, 1]} : vector<8x96xf32> to vector<8x32xf32>
    %23 = vector.extract_strided_slice %20 {offsets = [0, 64], sizes = [8, 32], strides = [1, 1]} : vector<8x96xf32> to vector<8x32xf32>
    %24 = vector.extract_strided_slice %14 {offsets = [0, 96], sizes = [8, 32], strides = [1, 1]} : vector<8x128xf32> to vector<8x32xf32>
    %25 = math.tanh %24 : vector<8x32xf32>
    %26 = arith.mulf %22, %11 : vector<8x32xf32>
    %27 = arith.mulf %21, %25 : vector<8x32xf32>
    %28 = arith.addf %26, %27 : vector<8x32xf32>
    %29 = math.tanh %28 : vector<8x32xf32>
    %30 = arith.mulf %23, %29 : vector<8x32xf32>
    %c0_19 = arith.constant 0 : index
    %c0_20 = arith.constant 0 : index
    %31 = vector.load %arg16[%c0_19, %c0_20] : memref<64x32xf32, #tpu.memory_space<vmem>>, vector<8x32xf32>
    tpu.vector_store %arg16[%c0_19, %c0_20], %30 {strides = array<i32>} : memref<64x32xf32, #tpu.memory_space<vmem>>, vector<8x32xf32>,
    %c8 = arith.constant 8 : index
    %c0_21 = arith.constant 0 : index
    %32 = vector.load %arg15[%c8, %c0_21] : memref<64x128xf32, #tpu.memory_space<vmem>>, vector<8x128xf32>
    %cst_22 = arith.constant dense<0.000000e+00> : vector<8x128xf32>
    %33 = tpu.matmul %30, %1, %cst_22 {dimension_numbers = #tpu.dot_dimension_numbers<[1], [0], [0], [1], [0, 0, 1, 1], [], []>} : vector<8x32xf32>, vector<32x128xf32>, vector<8x128xf32> -> vector<8x128xf32>
    %34 = arith.addf %32, %33 : vector<8x128xf32>
    %35 = vector.extract_strided_slice %34 {offsets = [0, 0], sizes = [8, 96], strides = [1, 1]} : vector<8x128xf32> to vector<8x96xf32>
    %36 = arith.negf %35 : vector<8x96xf32>
    %37 = math.exp %36 : vector<8x96xf32>
    %cst_23 = arith.constant 1.000000e+00 : f32
    %38 = vector.broadcast %cst_23 : f32 to vector<8x96xf32>
    %39 = arith.addf %38, %37 : vector<8x96xf32>
    %40 = arith.divf %38, %39 : vector<8x96xf32>
    %41 = vector.extract_strided_slice %40 {offsets = [0, 0], sizes = [8, 32], strides = [1, 1]} : vector<8x96xf32> to vector<8x32xf32>
    %42 = vector.extract_strided_slice %40 {offsets = [0, 32], sizes = [8, 32], strides = [1, 1]} : vector<8x96xf32> to vector<8x32xf32>
    %43 = vector.extract_strided_slice %40 {offsets = [0, 64], sizes = [8, 32], strides = [1, 1]} : vector<8x96xf32> to vector<8x32xf32>
    %44 = vector.extract_strided_slice %34 {offsets = [0, 96], sizes = [8, 32], strides = [1, 1]} : vector<8x128xf32> to vector<8x32xf32>
    %45 = math.tanh %44 : vector<8x32xf32>
    %46 = arith.mulf %42, %28 : vector<8x32xf32>
    %47 = arith.mulf %41, %45 : vector<8x32xf32>
    %48 = arith.addf %46, %47 : vector<8x32xf32>
    %49 = math.tanh %48 : vector<8x32xf32>
    %50 = arith.mulf %43, %49 : vector<8x32xf32>
    %c8_24 = arith.constant 8 : index
    %c0_25 = arith.constant 0 : index
    %51 = vector.load %arg16[%c8_24, %c0_25] : memref<64x32xf32, #tpu.memory_space<vmem>>, vector<8x32xf32>
    tpu.vector_store %arg16[%c8_24, %c0_25], %50 {strides = array<i32>} : memref<64x32xf32, #tpu.memory_space<vmem>>, vector<8x32xf32>,
    %c16 = arith.constant 16 : index
    %c0_26 = arith.constant 0 : index
    %52 = vector.load %arg15[%c16, %c0_26] : memref<64x128xf32, #tpu.memory_space<vmem>>, vector<8x128xf32>
    %cst_27 = arith.constant dense<0.000000e+00> : vector<8x128xf32>
    %53 = tpu.matmul %50, %1, %cst_27 {dimension_numbers = #tpu.dot_dimension_numbers<[1], [0], [0], [1], [0, 0, 1, 1], [], []>} : vector<8x32xf32>, vector<32x128xf32>, vector<8x128xf32> -> vector<8x128xf32>
    %54 = arith.addf %52, %53 : vector<8x128xf32>
    %55 = vector.extract_strided_slice %54 {offsets = [0, 0], sizes = [8, 96], strides = [1, 1]} : vector<8x128xf32> to vector<8x96xf32>
    %56 = arith.negf %55 : vector<8x96xf32>
    %57 = math.exp %56 : vector<8x96xf32>
    %cst_28 = arith.constant 1.000000e+00 : f32
    %58 = vector.broadcast %cst_28 : f32 to vector<8x96xf32>
    %59 = arith.addf %58, %57 : vector<8x96xf32>
    %60 = arith.divf %58, %59 : vector<8x96xf32>
    %61 = vector.extract_strided_slice %60 {offsets = [0, 0], sizes = [8, 32], strides = [1, 1]} : vector<8x96xf32> to vector<8x32xf32>
    %62 = vector.extract_strided_slice %60 {offsets = [0, 32], sizes = [8, 32], strides = [1, 1]} : vector<8x96xf32> to vector<8x32xf32>
    %63 = vector.extract_strided_slice %60 {offsets = [0, 64], sizes = [8, 32], strides = [1, 1]} : vector<8x96xf32> to vector<8x32xf32>
    %64 = vector.extract_strided_slice %54 {offsets = [0, 96], sizes = [8, 32], strides = [1, 1]} : vector<8x128xf32> to vector<8x32xf32>
    %65 = math.tanh %64 : vector<8x32xf32>
    %66 = arith.mulf %62, %48 : vector<8x32xf32>
    %67 = arith.mulf %61, %65 : vector<8x32xf32>
    %68 = arith.addf %66, %67 : vector<8x32xf32>
    %69 = math.tanh %68 : vector<8x32xf32>
    %70 = arith.mulf %63, %69 : vector<8x32xf32>
    %c16_29 = arith.constant 16 : index
    %c0_30 = arith.constant 0 : index
    %71 = vector.load %arg16[%c16_29, %c0_30] : memref<64x32xf32, #tpu.memory_space<vmem>>, vector<8x32xf32>
    tpu.vector_store %arg16[%c16_29, %c0_30], %70 {strides = array<i32>} : memref<64x32xf32, #tpu.memory_space<vmem>>, vector<8x32xf32>,
    %c24 = arith.constant 24 : index
    %c0_31 = arith.constant 0 : index
    %72 = vector.load %arg15[%c24, %c0_31] : memref<64x128xf32, #tpu.memory_space<vmem>>, vector<8x128xf32>
    %cst_32 = arith.constant dense<0.000000e+00> : vector<8x128xf32>
    %73 = tpu.matmul %70, %1, %cst_32 {dimension_numbers = #tpu.dot_dimension_numbers<[1], [0], [0], [1], [0, 0, 1, 1], [], []>} : vector<8x32xf32>, vector<32x128xf32>, vector<8x128xf32> -> vector<8x128xf32>
    %74 = arith.addf %72, %73 : vector<8x128xf32>
    %75 = vector.extract_strided_slice %74 {offsets = [0, 0], sizes = [8, 96], strides = [1, 1]} : vector<8x128xf32> to vector<8x96xf32>
    %76 = arith.negf %75 : vector<8x96xf32>
    %77 = math.exp %76 : vector<8x96xf32>
    %cst_33 = arith.constant 1.000000e+00 : f32
    %78 = vector.broadcast %cst_33 : f32 to vector<8x96xf32>
    %79 = arith.addf %78, %77 : vector<8x96xf32>
    %80 = arith.divf %78, %79 : vector<8x96xf32>
    %81 = vector.extract_strided_slice %80 {offsets = [0, 0], sizes = [8, 32], strides = [1, 1]} : vector<8x96xf32> to vector<8x32xf32>
    %82 = vector.extract_strided_slice %80 {offsets = [0, 32], sizes = [8, 32], strides = [1, 1]} : vector<8x96xf32> to vector<8x32xf32>
    %83 = vector.extract_strided_slice %80 {offsets = [0, 64], sizes = [8, 32], strides = [1, 1]} : vector<8x96xf32> to vector<8x32xf32>
    %84 = vector.extract_strided_slice %74 {offsets = [0, 96], sizes = [8, 32], strides = [1, 1]} : vector<8x128xf32> to vector<8x32xf32>
    %85 = math.tanh %84 : vector<8x32xf32>
    %86 = arith.mulf %82, %68 : vector<8x32xf32>
    %87 = arith.mulf %81, %85 : vector<8x32xf32>
    %88 = arith.addf %86, %87 : vector<8x32xf32>
    %89 = math.tanh %88 : vector<8x32xf32>
    %90 = arith.mulf %83, %89 : vector<8x32xf32>
    %c24_34 = arith.constant 24 : index
    %c0_35 = arith.constant 0 : index
    %91 = vector.load %arg16[%c24_34, %c0_35] : memref<64x32xf32, #tpu.memory_space<vmem>>, vector<8x32xf32>
    tpu.vector_store %arg16[%c24_34, %c0_35], %90 {strides = array<i32>} : memref<64x32xf32, #tpu.memory_space<vmem>>, vector<8x32xf32>,
    %c32 = arith.constant 32 : index
    %c0_36 = arith.constant 0 : index
    %92 = vector.load %arg15[%c32, %c0_36] : memref<64x128xf32, #tpu.memory_space<vmem>>, vector<8x128xf32>
    %cst_37 = arith.constant dense<0.000000e+00> : vector<8x128xf32>
    %93 = tpu.matmul %90, %1, %cst_37 {dimension_numbers = #tpu.dot_dimension_numbers<[1], [0], [0], [1], [0, 0, 1, 1], [], []>} : vector<8x32xf32>, vector<32x128xf32>, vector<8x128xf32> -> vector<8x128xf32>
    %94 = arith.addf %92, %93 : vector<8x128xf32>
    %95 = vector.extract_strided_slice %94 {offsets = [0, 0], sizes = [8, 96], strides = [1, 1]} : vector<8x128xf32> to vector<8x96xf32>
    %96 = arith.negf %95 : vector<8x96xf32>
    %97 = math.exp %96 : vector<8x96xf32>
    %cst_38 = arith.constant 1.000000e+00 : f32
    %98 = vector.broadcast %cst_38 : f32 to vector<8x96xf32>
    %99 = arith.addf %98, %97 : vector<8x96xf32>
    %100 = arith.divf %98, %99 : vector<8x96xf32>
    %101 = vector.extract_strided_slice %100 {offsets = [0, 0], sizes = [8, 32], strides = [1, 1]} : vector<8x96xf32> to vector<8x32xf32>
    %102 = vector.extract_strided_slice %100 {offsets = [0, 32], sizes = [8, 32], strides = [1, 1]} : vector<8x96xf32> to vector<8x32xf32>
    %103 = vector.extract_strided_slice %100 {offsets = [0, 64], sizes = [8, 32], strides = [1, 1]} : vector<8x96xf32> to vector<8x32xf32>
    %104 = vector.extract_strided_slice %94 {offsets = [0, 96], sizes = [8, 32], strides = [1, 1]} : vector<8x128xf32> to vector<8x32xf32>
    %105 = math.tanh %104 : vector<8x32xf32>
    %106 = arith.mulf %102, %88 : vector<8x32xf32>
    %107 = arith.mulf %101, %105 : vector<8x32xf32>
    %108 = arith.addf %106, %107 : vector<8x32xf32>
    %109 = math.tanh %108 : vector<8x32xf32>
    %110 = arith.mulf %103, %109 : vector<8x32xf32>
    %c32_39 = arith.constant 32 : index
    %c0_40 = arith.constant 0 : index
    %111 = vector.load %arg16[%c32_39, %c0_40] : memref<64x32xf32, #tpu.memory_space<vmem>>, vector<8x32xf32>
    tpu.vector_store %arg16[%c32_39, %c0_40], %110 {strides = array<i32>} : memref<64x32xf32, #tpu.memory_space<vmem>>, vector<8x32xf32>,
    %c40 = arith.constant 40 : index
    %c0_41 = arith.constant 0 : index
    %112 = vector.load %arg15[%c40, %c0_41] : memref<64x128xf32, #tpu.memory_space<vmem>>, vector<8x128xf32>
    %cst_42 = arith.constant dense<0.000000e+00> : vector<8x128xf32>
    %113 = tpu.matmul %110, %1, %cst_42 {dimension_numbers = #tpu.dot_dimension_numbers<[1], [0], [0], [1], [0, 0, 1, 1], [], []>} : vector<8x32xf32>, vector<32x128xf32>, vector<8x128xf32> -> vector<8x128xf32>
    %114 = arith.addf %112, %113 : vector<8x128xf32>
    %115 = vector.extract_strided_slice %114 {offsets = [0, 0], sizes = [8, 96], strides = [1, 1]} : vector<8x128xf32> to vector<8x96xf32>
    %116 = arith.negf %115 : vector<8x96xf32>
    %117 = math.exp %116 : vector<8x96xf32>
    %cst_43 = arith.constant 1.000000e+00 : f32
    %118 = vector.broadcast %cst_43 : f32 to vector<8x96xf32>
    %119 = arith.addf %118, %117 : vector<8x96xf32>
    %120 = arith.divf %118, %119 : vector<8x96xf32>
    %121 = vector.extract_strided_slice %120 {offsets = [0, 0], sizes = [8, 32], strides = [1, 1]} : vector<8x96xf32> to vector<8x32xf32>
    %122 = vector.extract_strided_slice %120 {offsets = [0, 32], sizes = [8, 32], strides = [1, 1]} : vector<8x96xf32> to vector<8x32xf32>
    %123 = vector.extract_strided_slice %120 {offsets = [0, 64], sizes = [8, 32], strides = [1, 1]} : vector<8x96xf32> to vector<8x32xf32>
    %124 = vector.extract_strided_slice %114 {offsets = [0, 96], sizes = [8, 32], strides = [1, 1]} : vector<8x128xf32> to vector<8x32xf32>
    %125 = math.tanh %124 : vector<8x32xf32>
    %126 = arith.mulf %122, %108 : vector<8x32xf32>
    %127 = arith.mulf %121, %125 : vector<8x32xf32>
    %128 = arith.addf %126, %127 : vector<8x32xf32>
    %129 = math.tanh %128 : vector<8x32xf32>
    %130 = arith.mulf %123, %129 : vector<8x32xf32>
    %c40_44 = arith.constant 40 : index
    %c0_45 = arith.constant 0 : index
    %131 = vector.load %arg16[%c40_44, %c0_45] : memref<64x32xf32, #tpu.memory_space<vmem>>, vector<8x32xf32>
    tpu.vector_store %arg16[%c40_44, %c0_45], %130 {strides = array<i32>} : memref<64x32xf32, #tpu.memory_space<vmem>>, vector<8x32xf32>,
    %c48 = arith.constant 48 : index
    %c0_46 = arith.constant 0 : index
    %132 = vector.load %arg15[%c48, %c0_46] : memref<64x128xf32, #tpu.memory_space<vmem>>, vector<8x128xf32>
    %cst_47 = arith.constant dense<0.000000e+00> : vector<8x128xf32>
    %133 = tpu.matmul %130, %1, %cst_47 {dimension_numbers = #tpu.dot_dimension_numbers<[1], [0], [0], [1], [0, 0, 1, 1], [], []>} : vector<8x32xf32>, vector<32x128xf32>, vector<8x128xf32> -> vector<8x128xf32>
    %134 = arith.addf %132, %133 : vector<8x128xf32>
    %135 = vector.extract_strided_slice %134 {offsets = [0, 0], sizes = [8, 96], strides = [1, 1]} : vector<8x128xf32> to vector<8x96xf32>
    %136 = arith.negf %135 : vector<8x96xf32>
    %137 = math.exp %136 : vector<8x96xf32>
    %cst_48 = arith.constant 1.000000e+00 : f32
    %138 = vector.broadcast %cst_48 : f32 to vector<8x96xf32>
    %139 = arith.addf %138, %137 : vector<8x96xf32>
    %140 = arith.divf %138, %139 : vector<8x96xf32>
    %141 = vector.extract_strided_slice %140 {offsets = [0, 0], sizes = [8, 32], strides = [1, 1]} : vector<8x96xf32> to vector<8x32xf32>
    %142 = vector.extract_strided_slice %140 {offsets = [0, 32], sizes = [8, 32], strides = [1, 1]} : vector<8x96xf32> to vector<8x32xf32>
    %143 = vector.extract_strided_slice %140 {offsets = [0, 64], sizes = [8, 32], strides = [1, 1]} : vector<8x96xf32> to vector<8x32xf32>
    %144 = vector.extract_strided_slice %134 {offsets = [0, 96], sizes = [8, 32], strides = [1, 1]} : vector<8x128xf32> to vector<8x32xf32>
    %145 = math.tanh %144 : vector<8x32xf32>
    %146 = arith.mulf %142, %128 : vector<8x32xf32>
    %147 = arith.mulf %141, %145 : vector<8x32xf32>
    %148 = arith.addf %146, %147 : vector<8x32xf32>
    %149 = math.tanh %148 : vector<8x32xf32>
    %150 = arith.mulf %143, %149 : vector<8x32xf32>
    %c48_49 = arith.constant 48 : index
    %c0_50 = arith.constant 0 : index
    %151 = vector.load %arg16[%c48_49, %c0_50] : memref<64x32xf32, #tpu.memory_space<vmem>>, vector<8x32xf32>
    tpu.vector_store %arg16[%c48_49, %c0_50], %150 {strides = array<i32>} : memref<64x32xf32, #tpu.memory_space<vmem>>, vector<8x32xf32>,
    %c56 = arith.constant 56 : index
    %c0_51 = arith.constant 0 : index
    %152 = vector.load %arg15[%c56, %c0_51] : memref<64x128xf32, #tpu.memory_space<vmem>>, vector<8x128xf32>
    %cst_52 = arith.constant dense<0.000000e+00> : vector<8x128xf32>
    %153 = tpu.matmul %150, %1, %cst_52 {dimension_numbers = #tpu.dot_dimension_numbers<[1], [0], [0], [1], [0, 0, 1, 1], [], []>} : vector<8x32xf32>, vector<32x128xf32>, vector<8x128xf32> -> vector<8x128xf32>
    %154 = arith.addf %152, %153 : vector<8x128xf32>
    %155 = vector.extract_strided_slice %154 {offsets = [0, 0], sizes = [8, 96], strides = [1, 1]} : vector<8x128xf32> to vector<8x96xf32>
    %156 = arith.negf %155 : vector<8x96xf32>
    %157 = math.exp %156 : vector<8x96xf32>
    %cst_53 = arith.constant 1.000000e+00 : f32
    %158 = vector.broadcast %cst_53 : f32 to vector<8x96xf32>
    %159 = arith.addf %158, %157 : vector<8x96xf32>
    %160 = arith.divf %158, %159 : vector<8x96xf32>
    %161 = vector.extract_strided_slice %160 {offsets = [0, 0], sizes = [8, 32], strides = [1, 1]} : vector<8x96xf32> to vector<8x32xf32>
    %162 = vector.extract_strided_slice %160 {offsets = [0, 32], sizes = [8, 32], strides = [1, 1]} : vector<8x96xf32> to vector<8x32xf32>
    %163 = vector.extract_strided_slice %160 {offsets = [0, 64], sizes = [8, 32], strides = [1, 1]} : vector<8x96xf32> to vector<8x32xf32>
    %164 = vector.extract_strided_slice %154 {offsets = [0, 96], sizes = [8, 32], strides = [1, 1]} : vector<8x128xf32> to vector<8x32xf32>
    %165 = math.tanh %164 : vector<8x32xf32>
    %166 = arith.mulf %162, %148 : vector<8x32xf32>
    %167 = arith.mulf %161, %165 : vector<8x32xf32>
    %168 = arith.addf %166, %167 : vector<8x32xf32>
    %169 = math.tanh %168 : vector<8x32xf32>
    %170 = arith.mulf %163, %169 : vector<8x32xf32>
    %c56_54 = arith.constant 56 : index
    %c0_55 = arith.constant 0 : index
    %171 = vector.load %arg16[%c56_54, %c0_55] : memref<64x32xf32, #tpu.memory_space<vmem>>, vector<8x32xf32>
    tpu.vector_store %arg16[%c56_54, %c0_55], %170 {strides = array<i32>} : memref<64x32xf32, #tpu.memory_space<vmem>>, vector<8x32xf32>,
    %c0_56 = arith.constant 0 : index
    %c0_57 = arith.constant 0 : index
    %c0_58 = arith.constant 0 : index
    %172 = vector.load %arg13[%c0_56, %c0_57, %c0_58] : memref<2x8x32xf32, #tpu.memory_space<vmem>>, vector<1x8x32xf32>
    %173 = vector.shape_cast %172 : vector<1x8x32xf32> to vector<8x32xf32>
    %174 = vector.shape_cast %170 : vector<8x32xf32> to vector<1x8x32xf32>
    tpu.vector_store %arg13[%c0_56, %c0_57, %c0_58], %174 {strides = array<i32>} : memref<2x8x32xf32, #tpu.memory_space<vmem>>, vector<1x8x32xf32>,
    %c0_59 = arith.constant 0 : index
    %c0_60 = arith.constant 0 : index
    %c0_61 = arith.constant 0 : index
    %175 = vector.load %arg14[%c0_59, %c0_60, %c0_61] : memref<2x8x32xf32, #tpu.memory_space<vmem>>, vector<1x8x32xf32>
    %176 = vector.shape_cast %175 : vector<1x8x32xf32> to vector<8x32xf32>
    %177 = vector.shape_cast %168 : vector<8x32xf32> to vector<1x8x32xf32>
    tpu.vector_store %arg14[%c0_59, %c0_60, %c0_61], %177 {strides = array<i32>} : memref<2x8x32xf32, #tpu.memory_space<vmem>>, vector<1x8x32xf32>,
    %c0_62 = arith.constant 0 : index
    %c0_63 = arith.constant 0 : index
    %178 = vector.load %arg7[%c0_62, %c0_63] : memref<32x128xf32, #tpu.memory_space<vmem>>, vector<32x128xf32>
    %c0_64 = arith.constant 0 : index
    %c0_65 = arith.constant 0 : index
    %179 = vector.load %arg8[%c0_64, %c0_65] : memref<32x128xf32, #tpu.memory_space<vmem>>, vector<32x128xf32>
    %c0_66 = arith.constant 0 : index
    %c0_67 = arith.constant 0 : index
    %180 = vector.load %arg9[%c0_66, %c0_67] : memref<1x128xf32, #tpu.memory_space<vmem>>, vector<1x128xf32>
    %c0_68 = arith.constant 0 : index
    %c0_69 = arith.constant 0 : index
    %181 = vector.load %arg16[%c0_68, %c0_69] : memref<64x32xf32, #tpu.memory_space<vmem>>, vector<64x32xf32>
    %cst_70 = arith.constant dense<0.000000e+00> : vector<64x128xf32>
    %182 = tpu.matmul %181, %178, %cst_70 {dimension_numbers = #tpu.dot_dimension_numbers<[1], [0], [0], [1], [0, 0, 1, 1], [], []>} : vector<64x32xf32>, vector<32x128xf32>, vector<64x128xf32> -> vector<64x128xf32>
    %183 = vector.broadcast %180 : vector<1x128xf32> to vector<64x128xf32>
    %184 = arith.addf %182, %183 : vector<64x128xf32>
    %c0_71 = arith.constant 0 : index
    %c0_72 = arith.constant 0 : index
    %185 = vector.load %arg15[%c0_71, %c0_72] : memref<64x128xf32, #tpu.memory_space<vmem>>, vector<64x128xf32>
    tpu.vector_store %arg15[%c0_71, %c0_72], %184 {strides = array<i32>} : memref<64x128xf32, #tpu.memory_space<vmem>>, vector<64x128xf32>,
    %c1 = arith.constant 1 : index
    %c0_73 = arith.constant 0 : index
    %c0_74 = arith.constant 0 : index
    %186 = vector.load %arg2[%c1, %c0_73, %c0_74] : memref<2x8x32xf32, #tpu.memory_space<vmem>>, vector<1x8x32xf32>
    %187 = vector.shape_cast %186 : vector<1x8x32xf32> to vector<8x32xf32>
    %c1_75 = arith.constant 1 : index
    %c0_76 = arith.constant 0 : index
    %c0_77 = arith.constant 0 : index
    %188 = vector.load %arg3[%c1_75, %c0_76, %c0_77] : memref<2x8x32xf32, #tpu.memory_space<vmem>>, vector<1x8x32xf32>
    %189 = vector.shape_cast %188 : vector<1x8x32xf32> to vector<8x32xf32>
    %c0_78 = arith.constant 0 : index
    %c0_79 = arith.constant 0 : index
    %190 = vector.load %arg15[%c0_78, %c0_79] : memref<64x128xf32, #tpu.memory_space<vmem>>, vector<8x128xf32>
    %cst_80 = arith.constant dense<0.000000e+00> : vector<8x128xf32>
    %191 = tpu.matmul %187, %179, %cst_80 {dimension_numbers = #tpu.dot_dimension_numbers<[1], [0], [0], [1], [0, 0, 1, 1], [], []>} : vector<8x32xf32>, vector<32x128xf32>, vector<8x128xf32> -> vector<8x128xf32>
    %192 = arith.addf %190, %191 : vector<8x128xf32>
    %193 = vector.extract_strided_slice %192 {offsets = [0, 0], sizes = [8, 96], strides = [1, 1]} : vector<8x128xf32> to vector<8x96xf32>
    %194 = arith.negf %193 : vector<8x96xf32>
    %195 = math.exp %194 : vector<8x96xf32>
    %cst_81 = arith.constant 1.000000e+00 : f32
    %196 = vector.broadcast %cst_81 : f32 to vector<8x96xf32>
    %197 = arith.addf %196, %195 : vector<8x96xf32>
    %198 = arith.divf %196, %197 : vector<8x96xf32>
    %199 = vector.extract_strided_slice %198 {offsets = [0, 0], sizes = [8, 32], strides = [1, 1]} : vector<8x96xf32> to vector<8x32xf32>
    %200 = vector.extract_strided_slice %198 {offsets = [0, 32], sizes = [8, 32], strides = [1, 1]} : vector<8x96xf32> to vector<8x32xf32>
    %201 = vector.extract_strided_slice %198 {offsets = [0, 64], sizes = [8, 32], strides = [1, 1]} : vector<8x96xf32> to vector<8x32xf32>
    %202 = vector.extract_strided_slice %192 {offsets = [0, 96], sizes = [8, 32], strides = [1, 1]} : vector<8x128xf32> to vector<8x32xf32>
    %203 = math.tanh %202 : vector<8x32xf32>
    %204 = arith.mulf %200, %189 : vector<8x32xf32>
    %205 = arith.mulf %199, %203 : vector<8x32xf32>
    %206 = arith.addf %204, %205 : vector<8x32xf32>
    %207 = math.tanh %206 : vector<8x32xf32>
    %208 = arith.mulf %201, %207 : vector<8x32xf32>
    %c0_82 = arith.constant 0 : index
    %c0_83 = arith.constant 0 : index
    %209 = vector.load %arg16[%c0_82, %c0_83] : memref<64x32xf32, #tpu.memory_space<vmem>>, vector<8x32xf32>
    tpu.vector_store %arg16[%c0_82, %c0_83], %208 {strides = array<i32>} : memref<64x32xf32, #tpu.memory_space<vmem>>, vector<8x32xf32>,
    %c8_84 = arith.constant 8 : index
    %c0_85 = arith.constant 0 : index
    %210 = vector.load %arg15[%c8_84, %c0_85] : memref<64x128xf32, #tpu.memory_space<vmem>>, vector<8x128xf32>
    %cst_86 = arith.constant dense<0.000000e+00> : vector<8x128xf32>
    %211 = tpu.matmul %208, %179, %cst_86 {dimension_numbers = #tpu.dot_dimension_numbers<[1], [0], [0], [1], [0, 0, 1, 1], [], []>} : vector<8x32xf32>, vector<32x128xf32>, vector<8x128xf32> -> vector<8x128xf32>
    %212 = arith.addf %210, %211 : vector<8x128xf32>
    %213 = vector.extract_strided_slice %212 {offsets = [0, 0], sizes = [8, 96], strides = [1, 1]} : vector<8x128xf32> to vector<8x96xf32>
    %214 = arith.negf %213 : vector<8x96xf32>
    %215 = math.exp %214 : vector<8x96xf32>
    %cst_87 = arith.constant 1.000000e+00 : f32
    %216 = vector.broadcast %cst_87 : f32 to vector<8x96xf32>
    %217 = arith.addf %216, %215 : vector<8x96xf32>
    %218 = arith.divf %216, %217 : vector<8x96xf32>
    %219 = vector.extract_strided_slice %218 {offsets = [0, 0], sizes = [8, 32], strides = [1, 1]} : vector<8x96xf32> to vector<8x32xf32>
    %220 = vector.extract_strided_slice %218 {offsets = [0, 32], sizes = [8, 32], strides = [1, 1]} : vector<8x96xf32> to vector<8x32xf32>
    %221 = vector.extract_strided_slice %218 {offsets = [0, 64], sizes = [8, 32], strides = [1, 1]} : vector<8x96xf32> to vector<8x32xf32>
    %222 = vector.extract_strided_slice %212 {offsets = [0, 96], sizes = [8, 32], strides = [1, 1]} : vector<8x128xf32> to vector<8x32xf32>
    %223 = math.tanh %222 : vector<8x32xf32>
    %224 = arith.mulf %220, %206 : vector<8x32xf32>
    %225 = arith.mulf %219, %223 : vector<8x32xf32>
    %226 = arith.addf %224, %225 : vector<8x32xf32>
    %227 = math.tanh %226 : vector<8x32xf32>
    %228 = arith.mulf %221, %227 : vector<8x32xf32>
    %c8_88 = arith.constant 8 : index
    %c0_89 = arith.constant 0 : index
    %229 = vector.load %arg16[%c8_88, %c0_89] : memref<64x32xf32, #tpu.memory_space<vmem>>, vector<8x32xf32>
    tpu.vector_store %arg16[%c8_88, %c0_89], %228 {strides = array<i32>} : memref<64x32xf32, #tpu.memory_space<vmem>>, vector<8x32xf32>,
    %c16_90 = arith.constant 16 : index
    %c0_91 = arith.constant 0 : index
    %230 = vector.load %arg15[%c16_90, %c0_91] : memref<64x128xf32, #tpu.memory_space<vmem>>, vector<8x128xf32>
    %cst_92 = arith.constant dense<0.000000e+00> : vector<8x128xf32>
    %231 = tpu.matmul %228, %179, %cst_92 {dimension_numbers = #tpu.dot_dimension_numbers<[1], [0], [0], [1], [0, 0, 1, 1], [], []>} : vector<8x32xf32>, vector<32x128xf32>, vector<8x128xf32> -> vector<8x128xf32>
    %232 = arith.addf %230, %231 : vector<8x128xf32>
    %233 = vector.extract_strided_slice %232 {offsets = [0, 0], sizes = [8, 96], strides = [1, 1]} : vector<8x128xf32> to vector<8x96xf32>
    %234 = arith.negf %233 : vector<8x96xf32>
    %235 = math.exp %234 : vector<8x96xf32>
    %cst_93 = arith.constant 1.000000e+00 : f32
    %236 = vector.broadcast %cst_93 : f32 to vector<8x96xf32>
    %237 = arith.addf %236, %235 : vector<8x96xf32>
    %238 = arith.divf %236, %237 : vector<8x96xf32>
    %239 = vector.extract_strided_slice %238 {offsets = [0, 0], sizes = [8, 32], strides = [1, 1]} : vector<8x96xf32> to vector<8x32xf32>
    %240 = vector.extract_strided_slice %238 {offsets = [0, 32], sizes = [8, 32], strides = [1, 1]} : vector<8x96xf32> to vector<8x32xf32>
    %241 = vector.extract_strided_slice %238 {offsets = [0, 64], sizes = [8, 32], strides = [1, 1]} : vector<8x96xf32> to vector<8x32xf32>
    %242 = vector.extract_strided_slice %232 {offsets = [0, 96], sizes = [8, 32], strides = [1, 1]} : vector<8x128xf32> to vector<8x32xf32>
    %243 = math.tanh %242 : vector<8x32xf32>
    %244 = arith.mulf %240, %226 : vector<8x32xf32>
    %245 = arith.mulf %239, %243 : vector<8x32xf32>
    %246 = arith.addf %244, %245 : vector<8x32xf32>
    %247 = math.tanh %246 : vector<8x32xf32>
    %248 = arith.mulf %241, %247 : vector<8x32xf32>
    %c16_94 = arith.constant 16 : index
    %c0_95 = arith.constant 0 : index
    %249 = vector.load %arg16[%c16_94, %c0_95] : memref<64x32xf32, #tpu.memory_space<vmem>>, vector<8x32xf32>
    tpu.vector_store %arg16[%c16_94, %c0_95], %248 {strides = array<i32>} : memref<64x32xf32, #tpu.memory_space<vmem>>, vector<8x32xf32>,
    %c24_96 = arith.constant 24 : index
    %c0_97 = arith.constant 0 : index
    %250 = vector.load %arg15[%c24_96, %c0_97] : memref<64x128xf32, #tpu.memory_space<vmem>>, vector<8x128xf32>
    %cst_98 = arith.constant dense<0.000000e+00> : vector<8x128xf32>
    %251 = tpu.matmul %248, %179, %cst_98 {dimension_numbers = #tpu.dot_dimension_numbers<[1], [0], [0], [1], [0, 0, 1, 1], [], []>} : vector<8x32xf32>, vector<32x128xf32>, vector<8x128xf32> -> vector<8x128xf32>
    %252 = arith.addf %250, %251 : vector<8x128xf32>
    %253 = vector.extract_strided_slice %252 {offsets = [0, 0], sizes = [8, 96], strides = [1, 1]} : vector<8x128xf32> to vector<8x96xf32>
    %254 = arith.negf %253 : vector<8x96xf32>
    %255 = math.exp %254 : vector<8x96xf32>
    %cst_99 = arith.constant 1.000000e+00 : f32
    %256 = vector.broadcast %cst_99 : f32 to vector<8x96xf32>
    %257 = arith.addf %256, %255 : vector<8x96xf32>
    %258 = arith.divf %256, %257 : vector<8x96xf32>
    %259 = vector.extract_strided_slice %258 {offsets = [0, 0], sizes = [8, 32], strides = [1, 1]} : vector<8x96xf32> to vector<8x32xf32>
    %260 = vector.extract_strided_slice %258 {offsets = [0, 32], sizes = [8, 32], strides = [1, 1]} : vector<8x96xf32> to vector<8x32xf32>
    %261 = vector.extract_strided_slice %258 {offsets = [0, 64], sizes = [8, 32], strides = [1, 1]} : vector<8x96xf32> to vector<8x32xf32>
    %262 = vector.extract_strided_slice %252 {offsets = [0, 96], sizes = [8, 32], strides = [1, 1]} : vector<8x128xf32> to vector<8x32xf32>
    %263 = math.tanh %262 : vector<8x32xf32>
    %264 = arith.mulf %260, %246 : vector<8x32xf32>
    %265 = arith.mulf %259, %263 : vector<8x32xf32>
    %266 = arith.addf %264, %265 : vector<8x32xf32>
    %267 = math.tanh %266 : vector<8x32xf32>
    %268 = arith.mulf %261, %267 : vector<8x32xf32>
    %c24_100 = arith.constant 24 : index
    %c0_101 = arith.constant 0 : index
    %269 = vector.load %arg16[%c24_100, %c0_101] : memref<64x32xf32, #tpu.memory_space<vmem>>, vector<8x32xf32>
    tpu.vector_store %arg16[%c24_100, %c0_101], %268 {strides = array<i32>} : memref<64x32xf32, #tpu.memory_space<vmem>>, vector<8x32xf32>,
    %c32_102 = arith.constant 32 : index
    %c0_103 = arith.constant 0 : index
    %270 = vector.load %arg15[%c32_102, %c0_103] : memref<64x128xf32, #tpu.memory_space<vmem>>, vector<8x128xf32>
    %cst_104 = arith.constant dense<0.000000e+00> : vector<8x128xf32>
    %271 = tpu.matmul %268, %179, %cst_104 {dimension_numbers = #tpu.dot_dimension_numbers<[1], [0], [0], [1], [0, 0, 1, 1], [], []>} : vector<8x32xf32>, vector<32x128xf32>, vector<8x128xf32> -> vector<8x128xf32>
    %272 = arith.addf %270, %271 : vector<8x128xf32>
    %273 = vector.extract_strided_slice %272 {offsets = [0, 0], sizes = [8, 96], strides = [1, 1]} : vector<8x128xf32> to vector<8x96xf32>
    %274 = arith.negf %273 : vector<8x96xf32>
    %275 = math.exp %274 : vector<8x96xf32>
    %cst_105 = arith.constant 1.000000e+00 : f32
    %276 = vector.broadcast %cst_105 : f32 to vector<8x96xf32>
    %277 = arith.addf %276, %275 : vector<8x96xf32>
    %278 = arith.divf %276, %277 : vector<8x96xf32>
    %279 = vector.extract_strided_slice %278 {offsets = [0, 0], sizes = [8, 32], strides = [1, 1]} : vector<8x96xf32> to vector<8x32xf32>
    %280 = vector.extract_strided_slice %278 {offsets = [0, 32], sizes = [8, 32], strides = [1, 1]} : vector<8x96xf32> to vector<8x32xf32>
    %281 = vector.extract_strided_slice %278 {offsets = [0, 64], sizes = [8, 32], strides = [1, 1]} : vector<8x96xf32> to vector<8x32xf32>
    %282 = vector.extract_strided_slice %272 {offsets = [0, 96], sizes = [8, 32], strides = [1, 1]} : vector<8x128xf32> to vector<8x32xf32>
    %283 = math.tanh %282 : vector<8x32xf32>
    %284 = arith.mulf %280, %266 : vector<8x32xf32>
    %285 = arith.mulf %279, %283 : vector<8x32xf32>
    %286 = arith.addf %284, %285 : vector<8x32xf32>
    %287 = math.tanh %286 : vector<8x32xf32>
    %288 = arith.mulf %281, %287 : vector<8x32xf32>
    %c32_106 = arith.constant 32 : index
    %c0_107 = arith.constant 0 : index
    %289 = vector.load %arg16[%c32_106, %c0_107] : memref<64x32xf32, #tpu.memory_space<vmem>>, vector<8x32xf32>
    tpu.vector_store %arg16[%c32_106, %c0_107], %288 {strides = array<i32>} : memref<64x32xf32, #tpu.memory_space<vmem>>, vector<8x32xf32>,
    %c40_108 = arith.constant 40 : index
    %c0_109 = arith.constant 0 : index
    %290 = vector.load %arg15[%c40_108, %c0_109] : memref<64x128xf32, #tpu.memory_space<vmem>>, vector<8x128xf32>
    %cst_110 = arith.constant dense<0.000000e+00> : vector<8x128xf32>
    %291 = tpu.matmul %288, %179, %cst_110 {dimension_numbers = #tpu.dot_dimension_numbers<[1], [0], [0], [1], [0, 0, 1, 1], [], []>} : vector<8x32xf32>, vector<32x128xf32>, vector<8x128xf32> -> vector<8x128xf32>
    %292 = arith.addf %290, %291 : vector<8x128xf32>
    %293 = vector.extract_strided_slice %292 {offsets = [0, 0], sizes = [8, 96], strides = [1, 1]} : vector<8x128xf32> to vector<8x96xf32>
    %294 = arith.negf %293 : vector<8x96xf32>
    %295 = math.exp %294 : vector<8x96xf32>
    %cst_111 = arith.constant 1.000000e+00 : f32
    %296 = vector.broadcast %cst_111 : f32 to vector<8x96xf32>
    %297 = arith.addf %296, %295 : vector<8x96xf32>
    %298 = arith.divf %296, %297 : vector<8x96xf32>
    %299 = vector.extract_strided_slice %298 {offsets = [0, 0], sizes = [8, 32], strides = [1, 1]} : vector<8x96xf32> to vector<8x32xf32>
    %300 = vector.extract_strided_slice %298 {offsets = [0, 32], sizes = [8, 32], strides = [1, 1]} : vector<8x96xf32> to vector<8x32xf32>
    %301 = vector.extract_strided_slice %298 {offsets = [0, 64], sizes = [8, 32], strides = [1, 1]} : vector<8x96xf32> to vector<8x32xf32>
    %302 = vector.extract_strided_slice %292 {offsets = [0, 96], sizes = [8, 32], strides = [1, 1]} : vector<8x128xf32> to vector<8x32xf32>
    %303 = math.tanh %302 : vector<8x32xf32>
    %304 = arith.mulf %300, %286 : vector<8x32xf32>
    %305 = arith.mulf %299, %303 : vector<8x32xf32>
    %306 = arith.addf %304, %305 : vector<8x32xf32>
    %307 = math.tanh %306 : vector<8x32xf32>
    %308 = arith.mulf %301, %307 : vector<8x32xf32>
    %c40_112 = arith.constant 40 : index
    %c0_113 = arith.constant 0 : index
    %309 = vector.load %arg16[%c40_112, %c0_113] : memref<64x32xf32, #tpu.memory_space<vmem>>, vector<8x32xf32>
    tpu.vector_store %arg16[%c40_112, %c0_113], %308 {strides = array<i32>} : memref<64x32xf32, #tpu.memory_space<vmem>>, vector<8x32xf32>,
    %c48_114 = arith.constant 48 : index
    %c0_115 = arith.constant 0 : index
    %310 = vector.load %arg15[%c48_114, %c0_115] : memref<64x128xf32, #tpu.memory_space<vmem>>, vector<8x128xf32>
    %cst_116 = arith.constant dense<0.000000e+00> : vector<8x128xf32>
    %311 = tpu.matmul %308, %179, %cst_116 {dimension_numbers = #tpu.dot_dimension_numbers<[1], [0], [0], [1], [0, 0, 1, 1], [], []>} : vector<8x32xf32>, vector<32x128xf32>, vector<8x128xf32> -> vector<8x128xf32>
    %312 = arith.addf %310, %311 : vector<8x128xf32>
    %313 = vector.extract_strided_slice %312 {offsets = [0, 0], sizes = [8, 96], strides = [1, 1]} : vector<8x128xf32> to vector<8x96xf32>
    %314 = arith.negf %313 : vector<8x96xf32>
    %315 = math.exp %314 : vector<8x96xf32>
    %cst_117 = arith.constant 1.000000e+00 : f32
    %316 = vector.broadcast %cst_117 : f32 to vector<8x96xf32>
    %317 = arith.addf %316, %315 : vector<8x96xf32>
    %318 = arith.divf %316, %317 : vector<8x96xf32>
    %319 = vector.extract_strided_slice %318 {offsets = [0, 0], sizes = [8, 32], strides = [1, 1]} : vector<8x96xf32> to vector<8x32xf32>
    %320 = vector.extract_strided_slice %318 {offsets = [0, 32], sizes = [8, 32], strides = [1, 1]} : vector<8x96xf32> to vector<8x32xf32>
    %321 = vector.extract_strided_slice %318 {offsets = [0, 64], sizes = [8, 32], strides = [1, 1]} : vector<8x96xf32> to vector<8x32xf32>
    %322 = vector.extract_strided_slice %312 {offsets = [0, 96], sizes = [8, 32], strides = [1, 1]} : vector<8x128xf32> to vector<8x32xf32>
    %323 = math.tanh %322 : vector<8x32xf32>
    %324 = arith.mulf %320, %306 : vector<8x32xf32>
    %325 = arith.mulf %319, %323 : vector<8x32xf32>
    %326 = arith.addf %324, %325 : vector<8x32xf32>
    %327 = math.tanh %326 : vector<8x32xf32>
    %328 = arith.mulf %321, %327 : vector<8x32xf32>
    %c48_118 = arith.constant 48 : index
    %c0_119 = arith.constant 0 : index
    %329 = vector.load %arg16[%c48_118, %c0_119] : memref<64x32xf32, #tpu.memory_space<vmem>>, vector<8x32xf32>
    tpu.vector_store %arg16[%c48_118, %c0_119], %328 {strides = array<i32>} : memref<64x32xf32, #tpu.memory_space<vmem>>, vector<8x32xf32>,
    %c56_120 = arith.constant 56 : index
    %c0_121 = arith.constant 0 : index
    %330 = vector.load %arg15[%c56_120, %c0_121] : memref<64x128xf32, #tpu.memory_space<vmem>>, vector<8x128xf32>
    %cst_122 = arith.constant dense<0.000000e+00> : vector<8x128xf32>
    %331 = tpu.matmul %328, %179, %cst_122 {dimension_numbers = #tpu.dot_dimension_numbers<[1], [0], [0], [1], [0, 0, 1, 1], [], []>} : vector<8x32xf32>, vector<32x128xf32>, vector<8x128xf32> -> vector<8x128xf32>
    %332 = arith.addf %330, %331 : vector<8x128xf32>
    %333 = vector.extract_strided_slice %332 {offsets = [0, 0], sizes = [8, 96], strides = [1, 1]} : vector<8x128xf32> to vector<8x96xf32>
    %334 = arith.negf %333 : vector<8x96xf32>
    %335 = math.exp %334 : vector<8x96xf32>
    %cst_123 = arith.constant 1.000000e+00 : f32
    %336 = vector.broadcast %cst_123 : f32 to vector<8x96xf32>
    %337 = arith.addf %336, %335 : vector<8x96xf32>
    %338 = arith.divf %336, %337 : vector<8x96xf32>
    %339 = vector.extract_strided_slice %338 {offsets = [0, 0], sizes = [8, 32], strides = [1, 1]} : vector<8x96xf32> to vector<8x32xf32>
    %340 = vector.extract_strided_slice %338 {offsets = [0, 32], sizes = [8, 32], strides = [1, 1]} : vector<8x96xf32> to vector<8x32xf32>
    %341 = vector.extract_strided_slice %338 {offsets = [0, 64], sizes = [8, 32], strides = [1, 1]} : vector<8x96xf32> to vector<8x32xf32>
    %342 = vector.extract_strided_slice %332 {offsets = [0, 96], sizes = [8, 32], strides = [1, 1]} : vector<8x128xf32> to vector<8x32xf32>
    %343 = math.tanh %342 : vector<8x32xf32>
    %344 = arith.mulf %340, %326 : vector<8x32xf32>
    %345 = arith.mulf %339, %343 : vector<8x32xf32>
    %346 = arith.addf %344, %345 : vector<8x32xf32>
    %347 = math.tanh %346 : vector<8x32xf32>
    %348 = arith.mulf %341, %347 : vector<8x32xf32>
    %c56_124 = arith.constant 56 : index
    %c0_125 = arith.constant 0 : index
    %349 = vector.load %arg16[%c56_124, %c0_125] : memref<64x32xf32, #tpu.memory_space<vmem>>, vector<8x32xf32>
    tpu.vector_store %arg16[%c56_124, %c0_125], %348 {strides = array<i32>} : memref<64x32xf32, #tpu.memory_space<vmem>>, vector<8x32xf32>,
    %c1_126 = arith.constant 1 : index
    %c0_127 = arith.constant 0 : index
    %c0_128 = arith.constant 0 : index
    %350 = vector.load %arg13[%c1_126, %c0_127, %c0_128] : memref<2x8x32xf32, #tpu.memory_space<vmem>>, vector<1x8x32xf32>
    %351 = vector.shape_cast %350 : vector<1x8x32xf32> to vector<8x32xf32>
    %352 = vector.shape_cast %348 : vector<8x32xf32> to vector<1x8x32xf32>
    tpu.vector_store %arg13[%c1_126, %c0_127, %c0_128], %352 {strides = array<i32>} : memref<2x8x32xf32, #tpu.memory_space<vmem>>, vector<1x8x32xf32>,
    %c1_129 = arith.constant 1 : index
    %c0_130 = arith.constant 0 : index
    %c0_131 = arith.constant 0 : index
    %353 = vector.load %arg14[%c1_129, %c0_130, %c0_131] : memref<2x8x32xf32, #tpu.memory_space<vmem>>, vector<1x8x32xf32>
    %354 = vector.shape_cast %353 : vector<1x8x32xf32> to vector<8x32xf32>
    %355 = vector.shape_cast %346 : vector<8x32xf32> to vector<1x8x32xf32>
    tpu.vector_store %arg14[%c1_129, %c0_130, %c0_131], %355 {strides = array<i32>} : memref<2x8x32xf32, #tpu.memory_space<vmem>>, vector<1x8x32xf32>,
    %c0_132 = arith.constant 0 : index
    %c0_133 = arith.constant 0 : index
    %356 = vector.load %arg16[%c0_132, %c0_133] : memref<64x32xf32, #tpu.memory_space<vmem>>, vector<64x32xf32>
    %c0_134 = arith.constant 0 : index
    %c0_135 = arith.constant 0 : index
    %357 = vector.load %arg10[%c0_134, %c0_135] : memref<32x128xf32, #tpu.memory_space<vmem>>, vector<32x128xf32>
    %cst_136 = arith.constant dense<0.000000e+00> : vector<64x128xf32>
    %358 = tpu.matmul %356, %357, %cst_136 {dimension_numbers = #tpu.dot_dimension_numbers<[1], [0], [0], [1], [0, 0, 1, 1], [], []>} : vector<64x32xf32>, vector<32x128xf32>, vector<64x128xf32> -> vector<64x128xf32>
    %c0_137 = arith.constant 0 : index
    %c0_138 = arith.constant 0 : index
    %359 = vector.load %arg11[%c0_137, %c0_138] : memref<1x128xf32, #tpu.memory_space<vmem>>, vector<1x128xf32>
    %360 = vector.broadcast %359 : vector<1x128xf32> to vector<64x128xf32>
    %361 = arith.addf %358, %360 : vector<64x128xf32>
    %c0_139 = arith.constant 0 : index
    %c0_140 = arith.constant 0 : index
    %362 = vector.load %arg12[%c0_139, %c0_140] : memref<64x128xf32, #tpu.memory_space<vmem>>, vector<64x128xf32>
    tpu.vector_store %arg12[%c0_139, %c0_140], %361 {strides = array<i32>} : memref<64x128xf32, #tpu.memory_space<vmem>>, vector<64x128xf32>,
    return
  }
  func.func @transform_0(%arg0: i32) -> (i32, i32) {
    %c0_i32 = arith.constant 0 : i32
    %c0_i32_0 = arith.constant 0 : i32
    %c0_i32_1 = arith.constant 0 : i32
    return %c0_i32, %c0_i32_0 : i32, i32
  }
  func.func @transform_1(%arg0: i32) -> (i32, i32, i32) {
    %c0_i32 = arith.constant 0 : i32
    %c0_i32_0 = arith.constant 0 : i32
    %c0_i32_1 = arith.constant 0 : i32
    %c0_i32_2 = arith.constant 0 : i32
    return %c0_i32, %c0_i32_0, %c0_i32_1 : i32, i32, i32
  }
  func.func @transform_2(%arg0: i32) -> (i32, i32, i32) {
    %c0_i32 = arith.constant 0 : i32
    %c0_i32_0 = arith.constant 0 : i32
    %c0_i32_1 = arith.constant 0 : i32
    %c0_i32_2 = arith.constant 0 : i32
    return %c0_i32, %c0_i32_0, %c0_i32_1 : i32, i32, i32
  }
  func.func @transform_3(%arg0: i32) -> (i32, i32) {
    %c0_i32 = arith.constant 0 : i32
    %c0_i32_0 = arith.constant 0 : i32
    %c0_i32_1 = arith.constant 0 : i32
    return %c0_i32, %c0_i32_0 : i32, i32
  }
  func.func @transform_4(%arg0: i32) -> (i32, i32) {
    %c0_i32 = arith.constant 0 : i32
    %c0_i32_0 = arith.constant 0 : i32
    %c0_i32_1 = arith.constant 0 : i32
    return %c0_i32, %c0_i32_0 : i32, i32
  }
  func.func @transform_5(%arg0: i32) -> (i32, i32) {
    %c0_i32 = arith.constant 0 : i32
    %c0_i32_0 = arith.constant 0 : i32
    %c0_i32_1 = arith.constant 0 : i32
    return %c0_i32, %c0_i32_0 : i32, i32
  }
  func.func @transform_6(%arg0: i32) -> (i32, i32) {
    %c0_i32 = arith.constant 0 : i32
    %c0_i32_0 = arith.constant 0 : i32
    %c0_i32_1 = arith.constant 0 : i32
    return %c0_i32, %c0_i32_0 : i32, i32
  }
  func.func @transform_7(%arg0: i32) -> (i32, i32) {
    %c0_i32 = arith.constant 0 : i32
    %c0_i32_0 = arith.constant 0 : i32
    %c0_i32_1 = arith.constant 0 : i32
    return %c0_i32, %c0_i32_0 : i32, i32
  }
  func.func @transform_8(%arg0: i32) -> (i32, i32) {
    %c0_i32 = arith.constant 0 : i32
    %c0_i32_0 = arith.constant 0 : i32
    %c0_i32_1 = arith.constant 0 : i32
    return %c0_i32, %c0_i32_0 : i32, i32
  }
  func.func @transform_9(%arg0: i32) -> (i32, i32) {
    %c0_i32 = arith.constant 0 : i32
    %c0_i32_0 = arith.constant 0 : i32
    %c0_i32_1 = arith.constant 0 : i32
    return %c0_i32, %c0_i32_0 : i32, i32
  }
  func.func @transform_10(%arg0: i32) -> (i32, i32) {
    %c0_i32 = arith.constant 0 : i32
    %c0_i32_0 = arith.constant 0 : i32
    %c0_i32_1 = arith.constant 0 : i32
    return %c0_i32, %c0_i32_0 : i32, i32
  }
  func.func @transform_11(%arg0: i32) -> (i32, i32) {
    %c0_i32 = arith.constant 0 : i32
    %c0_i32_0 = arith.constant 0 : i32
    %c0_i32_1 = arith.constant 0 : i32
    return %c0_i32, %c0_i32_0 : i32, i32
  }
  func.func @transform_12(%arg0: i32) -> (i32, i32, i32) {
    %c0_i32 = arith.constant 0 : i32
    %c0_i32_0 = arith.constant 0 : i32
    %c0_i32_1 = arith.constant 0 : i32
    %c0_i32_2 = arith.constant 0 : i32
    return %c0_i32, %c0_i32_0, %c0_i32_1 : i32, i32, i32
  }
  func.func @transform_13(%arg0: i32) -> (i32, i32, i32) {
    %c0_i32 = arith.constant 0 : i32
    %c0_i32_0 = arith.constant 0 : i32
    %c0_i32_1 = arith.constant 0 : i32
    %c0_i32_2 = arith.constant 0 : i32
    return %c0_i32, %c0_i32_0, %c0_i32_1 : i32, i32, i32
  }
}

</mosaic_0001>

<bundles_post_ra>
// kernel: timeseries_lstm_forward.1
= control target key start
LH: loop header
LB: loop body
LE: loop exit
PB: predicated region body
PF: predicated region fallthrough
CT: control target
= control target key end

     0   :  { %vm86_vm0 = vcmask 1043456   ;;  %vm61_vm1 = vcmask 31744   ;;  %v2865_v8 = vmov 0.0|0.0   ;;  %vm2866_vm2 = vmmov 0   ;;  %s2868_s15 = smov 32   ;;  %s3382_s3 = inlined_call_operand.vmem [shape: f32[4,128], index: 3, kind: input, shape index: {}]   ;;  %s3383_s0 = inlined_call_operand.vmem [shape: f32[64,4], index: 0, kind: input, shape index: {}]   ;;  %s3384_s4 = inlined_call_operand.vmem [shape: f32[32,128], index: 4, kind: input, shape index: {}]   ;;  %s3385_s1 = inlined_call_operand.vmem [shape: f32[2,8,32], index: 1, kind: input, shape index: {}]   ;;  %s3386_s5 = inlined_call_operand.vmem [shape: f32[1,128], index: 5, kind: input, shape index: {}]   ;;  %s3387_s2 = inlined_call_operand.vmem [shape: f32[2,8,32], index: 2, kind: input, shape index: {}]   ;;  %s3388_s6 = inlined_call_operand.vmem [shape: f32[32,128], index: 6, kind: input, shape index: {}]   ;;  %s3389_s7 = inlined_call_operand.vmem [shape: f32[32,128], index: 7, kind: input, shape index: {}]   ;;  %s3390_s8 = inlined_call_operand.vmem [shape: f32[1,128], index: 8, kind: input, shape index: {}]   ;;  %s3391_s12 = inlined_call_operand.vmem [shape: f32[2,8,32], index: 12, kind: output, shape index: {1}]   ;;  %s3392_s9 = inlined_call_operand.vmem [shape: f32[32,128], index: 9, kind: input, shape index: {}]   ;;  %s3393_s10 = inlined_call_operand.vmem [shape: f32[1,128], index: 10, kind: input, shape index: {}]   ;;  %s3394_s11 = inlined_call_operand.vmem [shape: f32[64,128], index: 11, kind: output, shape index: {0}]   ;;  %s3395_s13 = inlined_call_operand.vmem [shape: f32[2,8,32], index: 13, kind: output, shape index: {2}]  }
   0x1   :  { %v41_v0 = vld [vmem:[%s3382_s3] sm:$0xf]  ;;  %v52_v2 = vld [vmem:[%s3383_s0 + $0x28] sm:$0xff]  ;;  %v53_v5 = vld [vmem:[%s3383_s0 + $0x30] sm:$0xff]  ;;  %v2867_v14 = vmov 0.0   ;;  %vm206_vm3 = vcmask 261120  }
   0x2   :  { %v51_v1 = vld [vmem:[%s3383_s0 + $0x20] sm:$0xff]  ;;  %2729 = vmatprep.subr.msk.mxu1 %vm86_vm0, %v41_v0  ;;  %v43_v4 = vld [vmem:[%s3384_s4 + $0x8] sm:$0xff]  ;;  %2387 = vmatprep.subr.msk.mxu0 %vm86_vm0, %v41_v0  ;;  %v44_v10 = vld [vmem:[%s3384_s4 + $0x10] sm:$0xff] }
   0x3   :  { %2395 = vmatprep.mubr.msk.f32.mxu1 %vm61_vm1, %v51_v1  ;;  %v42_v3 = vld [vmem:[%s3384_s4] sm:$0xff]  ;;  %2730 = vmatpush3.msk.msra.mxu1 %vm86_vm0, %v41_v0  ;;  %v48_v9 = vld [vmem:[%s3383_s0 + $0x8] sm:$0xff]  ;;  %v45_v11 = vld [vmem:[%s3384_s4 + $0x18] sm:$0xff] }
   0x4   :  { %v2962_v6 = vpack.c.bf16 %v43_v4, %v42_v3  ;;  %v47_v7 = vld [vmem:[%s3383_s0] sm:$0xff]  ;;  %2396 = vmatmul.mubr.msk.f32.vlgmr.msra.gmra.mrb[0].mxu1 %vm61_vm1, %v52_v2  ;;  %2617 = vmatprep.subr.bf16.mxu1 %v2865_v8  ;;  %v54_v12 = vld [vmem:[%s3383_s0 + $0x38] sm:$0xff]  ;;  %v2984_v13 = vpack.c.bf16 %v45_v11, %v44_v10  ;;  %v49_v57 = vld [vmem:[%s3383_s0 + $0x10] sm:$0xff] }
   0x5   :  { %2398 = vmatprep.mubr.msk.f32.mxu1 %vm61_vm1, %v53_v5  ;;  %2388 = vmatpush3.msk.msra.mxu0 %vm86_vm0, %v41_v0  ;;  %v203_v15 = vld [vmem:[%s3385_s1] sm:$0xff]  ;;  %v50_v58 = vld [vmem:[%s3383_s0 + $0x18] sm:$0xff] }
   0x6   :  { %2619 = vmatpush3.bf16.msra.mxu1 %v2962_v6  ;;  %2389 = vmatprep.mubr.msk.f32.mxu0 %vm61_vm1, %v47_v7  ;;  %v3017_v19 = vld [vmem:[%s3386_s5] ss:$0 sm:$0xff]  ;;  %s2869_s5 = smov 64  }
   0x7   :  { %2620 = vmatprep.subr.bf16.mxu1 %v2865_v8  ;;  %2390 = vmatmul.mubr.msk.f32.vlgmr.msra.gmra.mrb[0].mxu0 %vm61_vm1, %v48_v9  ;;  %v204_v28 = vld [vmem:[%s3387_s2] sm:$0xff] }
   0x8   :  { %2399 = vmatmul.mubr.msk.f32.gmra.mrb[2].mxu1 %vm61_vm1, %v54_v12  ;;  %2629 = vmatprep.subr.bf16.mxu0 %v2865_v8 }
   0x9   :  { %2409 = vmatprep.mubr.msk.f32.mxu1 %vm2866_vm2, %v2867_v14  ;;  %2631 = vmatpush3.bf16.msra.mxu0 %v2962_v6 }
   0xa   :  { %2622 = vmatpush3.bf16.msra.mxu1 %v2984_v13  ;;  %2632 = vmatprep.subr.bf16.mxu0 %v2865_v8 }
   0xb   :  { %2623 = vmatprep.subr.bf16.mxu1 %v2865_v8  ;;  %2392 = vmatprep.mubr.msk.f32.mxu0 %vm61_vm1, %v49_v57 }
   0xc   :  { %2393 = vmatmul.mubr.msk.f32.gmra.mrb[2].mxu0 %vm61_vm1, %v50_v58 }
   0xd   :  { %2410 = vmatmul.mubr.msk.f32.vlgmr.msra.gmra.mrb[4].mxu1 %vm206_vm3, %v203_v15  ;;  %2634 = vmatpush3.bf16.msra.mxu0 %v2984_v13 }
   0xe   :  { %2625 = vmatpush3.bf16.msra.mxu1 %v2962_v6  ;;  %2420 = vmatprep.mubr.msk.f32.mxu1 %vm2866_vm2, %v2867_v14 }
   0xf   :  { %2626 = vmatprep.subr.bf16.mxu1 %v2865_v8  ;;  %2641 = vmatprep.subr.bf16.mxu0 %v2865_v8 }
  0x10   :  { %2431 = vmatprep.mubr.msk.f32.mxu0 %vm2866_vm2, %v2867_v14 }
  0x12   :  { %2628 = vmatpush3.bf16.msra.mxu1 %v2984_v13 }
  0x13   :  { %2635 = vmatprep.subr.bf16.mxu1 %v2865_v8 }
  0xd7   :  { %v3010_v16 = vpop.f32.mrb[0].mxu1 }
  0xd8   :  { %v3012_v17 = vpop.f32.mrb[1].mxu1 }
  0xda   :  { %v2391_v18 = vpop.f32.mrb[0].mxu0 }
  0xdb   :  { %v3019_v20 = vpop.f32.mrb[2].mxu1  ;;  %v156_v21 = vpop.f32.mrb[1].mxu0  ;;  %v162_v43 = vadd.f32 %v2391_v18, %v3017_v19 }
  0xdc   :  { %v3021_v22 = vpop.f32.mrb[3].mxu1  ;;  %v157_v23 = vadd.f32 %v3017_v19, %v156_v21 }
  0xdf   :  { %v2394_v62 = vpop.f32.mrb[2].mxu0 }
  0xe0   :  { %v276_v24 = vpop.f32.mrb[4].mxu1  ;;  %v166_v63 = vpop.f32.mrb[3].mxu0 }
  0xe1   :  { %v280_v25 = vadd.f32 %v276_v24, %v157_v23  ;;  %v2411_v26 = vpop.f32.mrb[5].mxu1  ;;  %v167_v1 = vadd.f32 %v3017_v19, %v166_v63  ;;  %v182_v63 = vadd.f32 %v3010_v16, %v3017_v19 }
  0xe3   :  { %2737 = vtanh.f32 %v280_v25  ;;  %v2221_v29 = vmul.f32 -1.442695, %v280_v25 }
  0xe5   :  { %2739 = vpow2.f32 %v2221_v29 }
  0xed   :  { %v2738_v27 = vpop.eup %2737 }
  0xee   :  { %294 = vrot.lane.b32.xlu0 %v2738_v27, %s2868_s15 }
  0xef   :  { %v2740_v30 = vpop.eup %2739 }
  0xf0   :  { %v284_v31 = vadd.f32 1.0, %v2740_v30 }
  0xf2   :  { %289 = vrot.lane.b32.xlu0 %v204_v28, %s2868_s15  ;;  %2741 = vrcp.f32 %v284_v31  ;;  %v172_v28 = vadd.f32 %v2394_v62, %v3017_v19 }
  0xfc   :  { %v2742_v32 = vpop.eup %2741 }
 0x160   :  { %v295_v33 = vpop.permute.xlu0 %294 }
 0x161   :  { %v297_v34 = vmul.f32 %v2742_v32, %v295_v33 }
 0x163   :  { %299 = vrot.lane.b32.xlu1 %v297_v34, %s2868_s15 }
 0x164   :  { %v290_v35 = vpop.permute.xlu0 %289 }
 0x165   :  { %v292_v36 = vmul.f32 %v2742_v32, %v290_v35 }
 0x1d5   :  { %v300_v37 = vpop.permute.xlu1 %299 }
 0x1d6   :  { %v302_v38 = vadd.f32 %v300_v37, %v292_v36 }
 0x1d8   :  { %2743 = vtanh.f32 %v302_v38 }
 0x1e2   :  { %v2744_v39 = vpop.eup %2743 }
 0x1e3   :  { %305 = vrot.lane.b32.xlu1 %v2744_v39, %s2868_s15 }
 0x255   :  { %v306_v40 = vpop.permute.xlu1 %305 }
 0x256   :  { %v308_v41 = vmul.f32 %v2742_v32, %v306_v40 }
 0x258   :  { %310 = vrot.lane.b32.xlu0 %v308_v41, %s2869_s5 }
 0x2ca   :  { %v311_v42 = vpop.permute.xlu0 %310 }
 0x2cb   :  { %313 = vst.msk [vmem:[#allocation3] sm:$0xff] %vm206_vm3, %v311_v42  ;;  %2421 = vmatmul.mubr.msk.f32.vlgmr.msra.gmra.mrb[6].mxu1 %vm206_vm3, %v311_v42 }
 0x2cc   :  { %2637 = vmatpush3.bf16.msra.mxu1 %v2962_v6  ;;  %2442 = vmatprep.mubr.msk.f32.mxu1 %vm2866_vm2, %v2867_v14 }
 0x2cd   :  { %2638 = vmatprep.subr.bf16.mxu1 %v2865_v8 }
 0x2d0   :  { %2640 = vmatpush3.bf16.msra.mxu1 %v2984_v13 }
 0x2d1   :  { %2647 = vmatprep.subr.bf16.mxu1 %v2865_v8 }
 0x39e   :  { %v383_v44 = vpop.f32.mrb[6].mxu1 }
 0x39f   :  { %v387_v45 = vadd.f32 %v383_v44, %v162_v43  ;;  %v2422_v46 = vpop.f32.mrb[7].mxu1 }
 0x3a0   :  { %v177_v46 = vadd.f32 %v3017_v19, %v3012_v17 }
 0x3a1   :  { %2745 = vtanh.f32 %v387_v45  ;;  %v2223_v48 = vmul.f32 -1.442695, %v387_v45 }
 0x3a3   :  { %2747 = vpow2.f32 %v2223_v48 }
 0x3ab   :  { %v2746_v47 = vpop.eup %2745 }
 0x3ac   :  { %397 = vrot.lane.b32.xlu1 %v2746_v47, %s2868_s15 }
 0x3ad   :  { %v2748_v49 = vpop.eup %2747 }
 0x3ae   :  { %v391_v50 = vadd.f32 1.0, %v2748_v49 }
 0x3b0   :  { %2749 = vrcp.f32 %v391_v50 }
 0x3ba   :  { %v2750_v51 = vpop.eup %2749 }
 0x3bb   :  { %v395_v54 = vmul.f32 %v2750_v51, %v302_v38 }
 0x41e   :  { %v398_v52 = vpop.permute.xlu1 %397 }
 0x41f   :  { %v400_v53 = vmul.f32 %v2750_v51, %v398_v52 }
 0x421   :  { %402 = vrot.lane.b32.xlu0 %v400_v53, %s2868_s15 }
 0x493   :  { %v403_v55 = vpop.permute.xlu0 %402 }
 0x494   :  { %v405_v56 = vadd.f32 %v403_v55, %v395_v54 }
 0x496   :  { %2751 = vtanh.f32 %v405_v56 }
 0x4a0   :  { %v2752_v59 = vpop.eup %2751 }
 0x4a1   :  { %408 = vrot.lane.b32.xlu1 %v2752_v59, %s2868_s15 }
 0x513   :  { %v409_v60 = vpop.permute.xlu1 %408 }
 0x514   :  { %v411_v61 = vmul.f32 %v2750_v51, %v409_v60 }
 0x516   :  { %413 = vrot.lane.b32.xlu0 %v411_v61, %s2869_s5 }
 0x588   :  { %v414_v0 = vpop.permute.xlu0 %413 }
 0x589   :  { %416 = vst.msk [vmem:[#allocation3 + $0x8] sm:$0xff] %vm206_vm3, %v414_v0  ;;  %2432 = vmatmul.mubr.msk.f32.vlgmr.msra.gmra.mrb[4].mxu0 %vm206_vm3, %v414_v0 }
 0x58a   :  { %2643 = vmatpush3.bf16.msra.mxu0 %v2962_v6  ;;  %2453 = vmatprep.mubr.msk.f32.mxu0 %vm2866_vm2, %v2867_v14 }
 0x58b   :  { %2644 = vmatprep.subr.bf16.mxu0 %v2865_v8 }
 0x58e   :  { %2646 = vmatpush3.bf16.msra.mxu0 %v2984_v13 }
 0x58f   :  { %2653 = vmatprep.subr.bf16.mxu0 %v2865_v8 }
 0x65c   :  { %v486_v2 = vpop.f32.mrb[4].mxu0 }
 0x65d   :  { %v490_v3 = vadd.f32 %v486_v2, %v167_v1  ;;  %v2433_v4 = vpop.f32.mrb[5].mxu0 }
 0x65f   :  { %2753 = vtanh.f32 %v490_v3  ;;  %v2225_v7 = vmul.f32 -1.442695, %v490_v3 }
 0x661   :  { %2755 = vpow2.f32 %v2225_v7 }
 0x669   :  { %v2754_v5 = vpop.eup %2753 }
 0x66a   :  { %500 = vrot.lane.b32.xlu1 %v2754_v5, %s2868_s15 }
 0x66b   :  { %v2756_v9 = vpop.eup %2755 }
 0x66c   :  { %v494_v10 = vadd.f32 1.0, %v2756_v9 }
 0x66e   :  { %2757 = vrcp.f32 %v494_v10 }
 0x678   :  { %v2758_v11 = vpop.eup %2757 }
 0x679   :  { %v498_v18 = vmul.f32 %v2758_v11, %v405_v56 }
 0x6dc   :  { %v501_v12 = vpop.permute.xlu1 %500 }
 0x6dd   :  { %v503_v15 = vmul.f32 %v2758_v11, %v501_v12  ;;  %v1041_v12 = vld [vmem:[%s3388_s6] sm:$0xff] }
 0x6df   :  { %505 = vrot.lane.b32.xlu0 %v503_v15, %s2868_s15  ;;  %v1042_v15 = vld [vmem:[%s3388_s6 + $0x8] sm:$0xff] }
 0x751   :  { %v506_v21 = vpop.permute.xlu0 %505 }
 0x752   :  { %v508_v23 = vadd.f32 %v506_v21, %v498_v18  ;;  %v2665_v18 = vpack.c.bf16 %v1042_v15, %v1041_v12 }
 0x754   :  { %2759 = vtanh.f32 %v508_v23 }
 0x75e   :  { %v2760_v24 = vpop.eup %2759 }
 0x75f   :  { %511 = vrot.lane.b32.xlu1 %v2760_v24, %s2868_s15 }
 0x7d1   :  { %v512_v25 = vpop.permute.xlu1 %511 }
 0x7d2   :  { %v514_v26 = vmul.f32 %v2758_v11, %v512_v25  ;;  %v1043_v25 = vld [vmem:[%s3388_s6 + $0x10] sm:$0xff] }
 0x7d4   :  { %516 = vrot.lane.b32.xlu0 %v514_v26, %s2869_s5  ;;  %v1044_v26 = vld [vmem:[%s3388_s6 + $0x18] sm:$0xff] }
 0x846   :  { %v517_v27 = vpop.permute.xlu0 %516 }
 0x847   :  { %519 = vst.msk [vmem:[#allocation3 + $0x10] sm:$0xff] %vm206_vm3, %v517_v27  ;;  %2443 = vmatmul.mubr.msk.f32.vlgmr.msra.gmra.mrb[8].mxu1 %vm206_vm3, %v517_v27  ;;  %v2669_v27 = vpack.c.bf16 %v1044_v26, %v1043_v25 }
 0x848   :  { %2649 = vmatpush3.bf16.msra.mxu1 %v2962_v6  ;;  %2464 = vmatprep.mubr.msk.f32.mxu1 %vm2866_vm2, %v2867_v14 }
 0x849   :  { %2650 = vmatprep.subr.bf16.mxu1 %v2865_v8 }
 0x84c   :  { %2652 = vmatpush3.bf16.msra.mxu1 %v2984_v13 }
 0x84d   :  { %2659 = vmatprep.subr.bf16.mxu1 %v2865_v8 }
 0x91a   :  { %v589_v29 = vpop.f32.mrb[8].mxu1 }
 0x91b   :  { %v593_v30 = vadd.f32 %v589_v29, %v172_v28  ;;  %v2444_v31 = vpop.f32.mrb[9].mxu1  ;;  %v1050_v29 = vld [vmem:[#allocation3] sm:$0xff] }
 0x91c   :  { %v1052_v31 = vld [vmem:[#allocation3 + $0x10] sm:$0xff] }
 0x91d   :  { %2761 = vtanh.f32 %v593_v30  ;;  %v2227_v33 = vmul.f32 -1.442695, %v593_v30  ;;  %v1051_v30 = vld [vmem:[#allocation3 + $0x8] sm:$0xff] }
 0x91f   :  { %2763 = vpow2.f32 %v2227_v33 }
 0x927   :  { %v2762_v32 = vpop.eup %2761 }
 0x928   :  { %603 = vrot.lane.b32.xlu1 %v2762_v32, %s2868_s15 }
 0x929   :  { %v2764_v34 = vpop.eup %2763 }
 0x92a   :  { %v597_v35 = vadd.f32 1.0, %v2764_v34 }
 0x92c   :  { %2765 = vrcp.f32 %v597_v35  ;;  %v187_v35 = vadd.f32 %v3017_v19, %v3021_v22 }
 0x936   :  { %v2766_v36 = vpop.eup %2765 }
 0x937   :  { %v601_v39 = vmul.f32 %v2766_v36, %v508_v23 }
 0x99a   :  { %v604_v37 = vpop.permute.xlu1 %603 }
 0x99b   :  { %v606_v38 = vmul.f32 %v2766_v36, %v604_v37 }
 0x99d   :  { %608 = vrot.lane.b32.xlu0 %v606_v38, %s2868_s15 }
 0xa0f   :  { %v609_v40 = vpop.permute.xlu0 %608 }
 0xa10   :  { %v611_v41 = vadd.f32 %v609_v40, %v601_v39 }
 0xa12   :  { %2767 = vtanh.f32 %v611_v41 }
 0xa1c   :  { %v2768_v42 = vpop.eup %2767 }
 0xa1d   :  { %614 = vrot.lane.b32.xlu1 %v2768_v42, %s2868_s15 }
 0xa8f   :  { %v615_v43 = vpop.permute.xlu1 %614 }
 0xa90   :  { %v617_v44 = vmul.f32 %v2766_v36, %v615_v43 }
 0xa92   :  { %619 = vrot.lane.b32.xlu0 %v617_v44, %s2869_s5 }
 0xb04   :  { %v620_v45 = vpop.permute.xlu0 %619 }
 0xb05   :  { %622 = vst.msk [vmem:[#allocation3 + $0x18] sm:$0xff] %vm206_vm3, %v620_v45  ;;  %2454 = vmatmul.mubr.msk.f32.vlgmr.msra.gmra.mrb[6].mxu0 %vm206_vm3, %v620_v45 }
 0xb06   :  { %2655 = vmatpush3.bf16.msra.mxu0 %v2962_v6  ;;  %2475 = vmatprep.mubr.msk.f32.mxu0 %vm2866_vm2, %v2867_v14 }
 0xb07   :  { %2656 = vmatprep.subr.bf16.mxu0 %v2865_v8 }
 0xb0a   :  { %2658 = vmatpush3.bf16.msra.mxu0 %v2984_v13 }
 0xb0b   :  { %2666 = vmatprep.subr.bf16.mxu0 %v2665_v18 }
 0xb0c   :  { %v1053_v32 = vld [vmem:[#allocation3 + $0x18] sm:$0xff] }
 0xbd8   :  { %v692_v47 = vpop.f32.mrb[6].mxu0 }
 0xbd9   :  { %v696_v48 = vadd.f32 %v692_v47, %v177_v46  ;;  %v2455_v49 = vpop.f32.mrb[7].mxu0 }
 0xbdb   :  { %2769 = vtanh.f32 %v696_v48  ;;  %v2229_v51 = vmul.f32 -1.442695, %v696_v48 }
 0xbdd   :  { %2771 = vpow2.f32 %v2229_v51 }
 0xbe5   :  { %v2770_v50 = vpop.eup %2769 }
 0xbe6   :  { %706 = vrot.lane.b32.xlu1 %v2770_v50, %s2868_s15 }
 0xbe7   :  { %v2772_v52 = vpop.eup %2771 }
 0xbe8   :  { %v700_v53 = vadd.f32 1.0, %v2772_v52 }
 0xbea   :  { %2773 = vrcp.f32 %v700_v53 }
 0xbf4   :  { %v2774_v54 = vpop.eup %2773 }
 0xbf5   :  { %v704_v57 = vmul.f32 %v2774_v54, %v611_v41 }
 0xc58   :  { %v707_v55 = vpop.permute.xlu1 %706 }
 0xc59   :  { %v709_v56 = vmul.f32 %v2774_v54, %v707_v55  ;;  %v1045_v55 = vld [vmem:[%s3389_s7] sm:$0xff] }
 0xc5b   :  { %711 = vrot.lane.b32.xlu0 %v709_v56, %s2868_s15  ;;  %v1046_v56 = vld [vmem:[%s3389_s7 + $0x8] sm:$0xff] }
 0xccd   :  { %v712_v58 = vpop.permute.xlu0 %711 }
 0xcce   :  { %v714_v17 = vadd.f32 %v712_v58, %v704_v57  ;;  %v3153_v57 = vpack.c.bf16 %v1046_v56, %v1045_v55  ;;  %v1047_v58 = vld [vmem:[%s3389_s7 + $0x10] sm:$0xff] }
 0xcd0   :  { %2775 = vtanh.f32 %v714_v17 }
 0xcda   :  { %v2776_v59 = vpop.eup %2775 }
 0xcdb   :  { %717 = vrot.lane.b32.xlu1 %v2776_v59, %s2868_s15 }
 0xd4d   :  { %v718_v60 = vpop.permute.xlu1 %717 }
 0xd4e   :  { %v720_v61 = vmul.f32 %v2774_v54, %v718_v60 }
 0xd50   :  { %722 = vrot.lane.b32.xlu0 %v720_v61, %s2869_s5 }
 0xdc2   :  { %v723_v62 = vpop.permute.xlu0 %722 }
 0xdc3   :  { %725 = vst.msk [vmem:[#allocation3 + $0x20] sm:$0xff] %vm206_vm3, %v723_v62  ;;  %2465 = vmatmul.mubr.msk.f32.vlgmr.msra.gmra.mrb[10].mxu1 %vm206_vm3, %v723_v62  ;;  %v2246_v62 = vld [vmem:[%s3387_s2 + $0x8] sm:$0xff] }
 0xdc4   :  { %2661 = vmatpush3.bf16.msra.mxu1 %v2962_v6  ;;  %2486 = vmatprep.mubr.msk.f32.mxu1 %vm2866_vm2, %v2867_v14 }
 0xdc5   :  { %2662 = vmatprep.subr.bf16.mxu1 %v2865_v8 }
 0xdc8   :  { %2664 = vmatpush3.bf16.msra.mxu1 %v2984_v13 }
 0xdc9   :  { %2673 = vmatprep.subr.bf16.mxu1 %v2865_v8 }
 0xdca   :  { %v1054_v33 = vld [vmem:[#allocation3 + $0x20] sm:$0xff] }
 0xe96   :  { %v795_v0 = vpop.f32.mrb[10].mxu1 }
 0xe97   :  { %v799_v1 = vadd.f32 %v795_v0, %v182_v63  ;;  %v2466_v2 = vpop.f32.mrb[11].mxu1  ;;  %v2245_v0 = vld [vmem:[%s3385_s1 + $0x8] sm:$0xff]  ;;  %s2870_s1 = smov 96  }
 0xe98   :  { %v192_v2 = vadd.f32 %v3019_v20, %v3017_v19 }
 0xe99   :  { %2777 = vtanh.f32 %v799_v1  ;;  %v2231_v6 = vmul.f32 -1.442695, %v799_v1 }
 0xe9b   :  { %2779 = vpow2.f32 %v2231_v6 }
 0xea3   :  { %v2778_v3 = vpop.eup %2777 }
 0xea4   :  { %809 = vrot.lane.b32.xlu1 %v2778_v3, %s2868_s15 }
 0xea5   :  { %v2780_v4 = vpop.eup %2779 }
 0xea6   :  { %v803_v5 = vadd.f32 1.0, %v2780_v4 }
 0xea8   :  { %2781 = vrcp.f32 %v803_v5  ;;  %v3196_v5 = vld [vmem:[%s3390_s8] ss:$0 sm:$0xff] }
 0xeb2   :  { %v2782_v7 = vpop.eup %2781 }
 0xeb3   :  { %v807_v10 = vmul.f32 %v2782_v7, %v714_v17  ;;  %v1048_v17 = vld [vmem:[%s3389_s7 + $0x18] sm:$0xff] }
 0xeb4   :  { %v3163_v59 = vpack.c.bf16 %v1048_v17, %v1047_v58 }
 0xf16   :  { %v810_v9 = vpop.permute.xlu1 %809 }
 0xf17   :  { %v812_v13 = vmul.f32 %v2782_v7, %v810_v9 }
 0xf19   :  { %814 = vrot.lane.b32.xlu0 %v812_v13, %s2868_s15 }
 0xf8b   :  { %v815_v11 = vpop.permute.xlu0 %814 }
 0xf8c   :  { %v817_v16 = vadd.f32 %v815_v11, %v807_v10 }
 0xf8e   :  { %2783 = vtanh.f32 %v817_v16 }
 0xf98   :  { %v2784_v21 = vpop.eup %2783 }
 0xf99   :  { %820 = vrot.lane.b32.xlu1 %v2784_v21, %s2868_s15 }
0x100b   :  { %v821_v23 = vpop.permute.xlu1 %820 }
0x100c   :  { %v823_v24 = vmul.f32 %v2782_v7, %v821_v23 }
0x100e   :  { %825 = vrot.lane.b32.xlu0 %v823_v24, %s2869_s5 }
0x1080   :  { %v826_v28 = vpop.permute.xlu0 %825 }
0x1081   :  { %828 = vst.msk [vmem:[#allocation3 + $0x28] sm:$0xff] %vm206_vm3, %v826_v28  ;;  %2476 = vmatmul.mubr.msk.f32.vlgmr.msra.gmra.mrb[8].mxu0 %vm206_vm3, %v826_v28 }
0x1082   :  { %2668 = vmatpush3.bf16.msra.mxu0 %v2665_v18  ;;  %2497 = vmatprep.mubr.msk.f32.mxu0 %vm206_vm3, %v1050_v29 }
0x1083   :  { %2670 = vmatprep.subr.bf16.mxu0 %v2669_v27 }
0x1086   :  { %2672 = vmatpush3.bf16.msra.mxu0 %v2669_v27 }
0x1087   :  { %2685 = vmatprep.subr.bf16.mxu0 %v2865_v8 }
0x1088   :  { %v1055_v34 = vld [vmem:[#allocation3 + $0x28] sm:$0xff] }
0x1089   :  { %2498 = vmatmul.mubr.msk.f32.vlgmr.msra.gmra.mrb[10].mxu0 %vm206_vm3, %v1051_v30 }
0x108a   :  { %2500 = vmatprep.mubr.msk.f32.mxu0 %vm206_vm3, %v1052_v31  ;;  %2687 = vmatpush3.bf16.msra.mxu0 %v3153_v57 }
0x108b   :  { %2688 = vmatprep.subr.bf16.mxu0 %v2865_v8 }
0x108d   :  { %2501 = vmatmul.mubr.msk.f32.gmra.mrb[12].mxu0 %vm206_vm3, %v1053_v32 }
0x108e   :  { %2503 = vmatprep.mubr.msk.f32.mxu0 %vm206_vm3, %v1054_v33  ;;  %2690 = vmatpush3.bf16.msra.mxu0 %v3163_v59 }
0x108f   :  { %2697 = vmatprep.subr.bf16.mxu0 %v2865_v8 }
0x1091   :  { %2504 = vmatmul.mubr.msk.f32.gmra.mrb[14].mxu0 %vm206_vm3, %v1055_v34 }
0x1154   :  { %v898_v36 = vpop.f32.mrb[8].mxu0 }
0x1155   :  { %v902_v37 = vadd.f32 %v898_v36, %v187_v35  ;;  %v2477_v38 = vpop.f32.mrb[9].mxu0 }
0x1157   :  { %2785 = vtanh.f32 %v902_v37  ;;  %v2233_v46 = vmul.f32 -1.442695, %v902_v37 }
0x1159   :  { %2787 = vpow2.f32 %v2233_v46 }
0x115c   :  { %v3131_v39 = vpop.f32.mrb[10].mxu0 }
0x115d   :  { %v1154_v40 = vpop.f32.mrb[11].mxu0 }
0x115e   :  { %v1155_v7 = vadd.f32 %v3196_v5, %v1154_v40 }
0x1160   :  { %v3133_v41 = vpop.f32.mrb[12].mxu0 }
0x1161   :  { %v2786_v42 = vpop.eup %2785  ;;  %v3135_v43 = vpop.f32.mrb[13].mxu0 }
0x1162   :  { %912 = vrot.lane.b32.xlu1 %v2786_v42, %s2868_s15 }
0x1163   :  { %v2788_v22 = vpop.eup %2787 }
0x1164   :  { %v3138_v44 = vpop.f32.mrb[14].mxu0  ;;  %v906_v47 = vadd.f32 1.0, %v2788_v22 }
0x1165   :  { %v3140_v45 = vpop.f32.mrb[15].mxu0 }
0x1166   :  { %2789 = vrcp.f32 %v906_v47  ;;  %v1160_v47 = vadd.f32 %v3131_v39, %v3196_v5 }
0x1170   :  { %v2790_v48 = vpop.eup %2789 }
0x1171   :  { %v910_v51 = vmul.f32 %v2790_v48, %v817_v16 }
0x11d4   :  { %v913_v49 = vpop.permute.xlu1 %912 }
0x11d5   :  { %v915_v50 = vmul.f32 %v2790_v48, %v913_v49 }
0x11d7   :  { %917 = vrot.lane.b32.xlu0 %v915_v50, %s2868_s15 }
0x1249   :  { %v918_v52 = vpop.permute.xlu0 %917 }
0x124a   :  { %v3143_v53 = vadd.f32 %v918_v52, %v910_v51 }
0x124c   :  { %2791 = vtanh.f32 %v3143_v53 }
0x1256   :  { %v2792_v54 = vpop.eup %2791 }
0x1257   :  { %923 = vrot.lane.b32.xlu1 %v2792_v54, %s2868_s15 }
0x12c9   :  { %v924_v60 = vpop.permute.xlu1 %923 }
0x12ca   :  { %v926_v61 = vmul.f32 %v2790_v48, %v924_v60 }
0x12cc   :  { %928 = vrot.lane.b32.xlu0 %v926_v61, %s2869_s5 }
0x12d0   :  { %1288 = vrot.lane.b32.xlu0 %v2246_v62, %s2868_s15 }
0x133e   :  { %v929_v63 = vpop.permute.xlu0 %928 }
0x133f   :  { %931 = vst.msk [vmem:[#allocation3 + $0x30] sm:$0xff] %vm206_vm3, %v929_v63  ;;  %2487 = vmatmul.mubr.msk.f32.vlgmr.msra.gmra.mrb[12].mxu1 %vm206_vm3, %v929_v63 }
0x1340   :  { %2675 = vmatpush3.bf16.msra.mxu1 %v3153_v57  ;;  %2517 = vmatprep.mubr.msk.f32.mxu1 %vm2866_vm2, %v2867_v14 }
0x1341   :  { %2676 = vmatprep.subr.bf16.mxu1 %v2865_v8 }
0x1342   :  { %v1289_v21 = vpop.permute.xlu0 %1288 }
0x1344   :  { %2678 = vmatpush3.bf16.msra.mxu1 %v3163_v59 }
0x1345   :  { %2679 = vmatprep.subr.bf16.mxu1 %v2865_v8 }
0x1346   :  { %v1056_v1 = vld [vmem:[#allocation3 + $0x30] sm:$0xff] }
0x1347   :  { %2518 = vmatmul.mubr.msk.f32.vlgmr.msra.gmra.mrb[14].mxu1 %vm206_vm3, %v2245_v0  ;;  %2506 = vmatprep.mubr.msk.f32.mxu0 %vm206_vm3, %v1056_v1 }
0x1348   :  { %2681 = vmatpush3.bf16.msra.mxu1 %v3153_v57  ;;  %2528 = vmatprep.mubr.msk.f32.mxu1 %vm2866_vm2, %v2867_v14 }
0x1349   :  { %2682 = vmatprep.subr.bf16.mxu1 %v2865_v8 }
0x134c   :  { %2684 = vmatpush3.bf16.msra.mxu1 %v3163_v59 }
0x134d   :  { %2691 = vmatprep.subr.bf16.mxu1 %v2865_v8 }
0x1412   :  { %v1001_v3 = vpop.f32.mrb[12].mxu1 }
0x1413   :  { %v1005_v6 = vadd.f32 %v1001_v3, %v192_v2  ;;  %v2488_v4 = vpop.f32.mrb[13].mxu1 }
0x1414   :  { %v1165_v4 = vadd.f32 %v3196_v5, %v3135_v43 }
0x1415   :  { %v2235_v28 = vmul.f32 -1.442695, %v1005_v6 }
0x141a   :  { %v1275_v9 = vpop.f32.mrb[14].mxu1 }
0x141b   :  { %v1279_v13 = vadd.f32 %v1275_v9, %v1155_v7  ;;  %v2519_v10 = vpop.f32.mrb[15].mxu1 }
0x141d   :  { %2793 = vtanh.f32 %v1279_v13  ;;  %v2248_v16 = vmul.f32 -1.442695, %v1279_v13 }
0x141f   :  { %2795 = vpow2.f32 %v2248_v16 }
0x1427   :  { %v2794_v11 = vpop.eup %2793 }
0x1428   :  { %1293 = vrot.lane.b32.xlu1 %v2794_v11, %s2868_s15 }
0x1429   :  { %v2796_v19 = vpop.eup %2795 }
0x142a   :  { %v1283_v20 = vadd.f32 1.0, %v2796_v19 }
0x142c   :  { %2797 = vrcp.f32 %v1283_v20 }
0x1436   :  { %v2798_v12 = vpop.eup %2797 }
0x1437   :  { %v1291_v23 = vmul.f32 %v2798_v12, %v1289_v21 }
0x149a   :  { %v1294_v15 = vpop.permute.xlu1 %1293 }
0x149b   :  { %v1296_v18 = vmul.f32 %v2798_v12, %v1294_v15 }
0x149d   :  { %1298 = vrot.lane.b32.xlu1 %v1296_v18, %s2868_s15 }
0x150f   :  { %v1299_v24 = vpop.permute.xlu1 %1298 }
0x1510   :  { %v1301_v25 = vadd.f32 %v1299_v24, %v1291_v23 }
0x1512   :  { %2799 = vtanh.f32 %v1301_v25 }
0x1513   :  { %2801 = vtanh.f32 %v1005_v6 }
0x1514   :  { %2803 = vpow2.f32 %v2235_v28 }
0x151c   :  { %v2800_v26 = vpop.eup %2799 }
0x151d   :  { %1304 = vrot.lane.b32.xlu0 %v2800_v26, %s2868_s15  ;;  %v2802_v27 = vpop.eup %2801 }
0x151e   :  { %v2804_v29 = vpop.eup %2803 }
0x151f   :  { %v1009_v30 = vadd.f32 1.0, %v2804_v29 }
0x1521   :  { %1015 = vrot.lane.b32.xlu0 %v2802_v27, %s2868_s15  ;;  %2805 = vrcp.f32 %v1009_v30  ;;  %v1170_v27 = vadd.f32 %v3133_v41, %v3196_v5 }
0x152b   :  { %v2806_v33 = vpop.eup %2805 }
0x152c   :  { %v1013_v37 = vmul.f32 %v2806_v33, %v3143_v53 }
0x158f   :  { %v1305_v31 = vpop.permute.xlu0 %1304 }
0x1590   :  { %v1307_v32 = vmul.f32 %v2798_v12, %v1305_v31 }
0x1592   :  { %1309 = vrot.lane.b32.xlu1 %v1307_v32, %s2869_s5 }
0x1593   :  { %v1016_v34 = vpop.permute.xlu0 %1015 }
0x1594   :  { %v1018_v35 = vmul.f32 %v2806_v33, %v1016_v34 }
0x1596   :  { %1020 = vrot.lane.b32.xlu0 %v1018_v35, %s2868_s15 }
0x1604   :  { %v1310_v36 = vpop.permute.xlu1 %1309 }
0x1605   :  { %1312 = vst.msk [vmem:[#allocation3] sm:$0xff] %vm206_vm3, %v1310_v36  ;;  %2529 = vmatmul.mubr.msk.f32.vlgmr.msra.gmra.mrb[16].mxu1 %vm206_vm3, %v1310_v36 }
0x1606   :  { %2693 = vmatpush3.bf16.msra.mxu1 %v3153_v57  ;;  %2550 = vmatprep.mubr.msk.f32.mxu1 %vm2866_vm2, %v2867_v14 }
0x1607   :  { %2694 = vmatprep.subr.bf16.mxu1 %v2865_v8 }
0x1608   :  { %v1021_v38 = vpop.permute.xlu0 %1020 }
0x1609   :  { %v3212_v40 = vadd.f32 %v1021_v38, %v1013_v37 }
0x160a   :  { %2696 = vmatpush3.bf16.msra.mxu1 %v3163_v59 }
0x160b   :  { %2807 = vtanh.f32 %v3212_v40  ;;  %2703 = vmatprep.subr.bf16.mxu1 %v2865_v8 }
0x1615   :  { %v2808_v42 = vpop.eup %2807 }
0x1616   :  { %1026 = vrot.lane.b32.xlu0 %v2808_v42, %s2868_s15 }
0x1688   :  { %v1027_v46 = vpop.permute.xlu0 %1026 }
0x1689   :  { %v1029_v22 = vmul.f32 %v2806_v33, %v1027_v46 }
0x168b   :  { %1031 = vrot.lane.b32.xlu0 %v1029_v22, %s2869_s5 }
0x16d8   :  { %v1382_v48 = vpop.f32.mrb[16].mxu1 }
0x16d9   :  { %v1386_v49 = vadd.f32 %v1382_v48, %v1160_v47  ;;  %v2530_v50 = vpop.f32.mrb[17].mxu1 }
0x16db   :  { %2809 = vtanh.f32 %v1386_v49  ;;  %v2250_v39 = vmul.f32 -1.442695, %v1386_v49  ;;  %v1175_v49 = vadd.f32 %v3196_v5, %v3140_v45 }
0x16dd   :  { %2811 = vpow2.f32 %v2250_v39 }
0x16e5   :  { %v2810_v51 = vpop.eup %2809 }
0x16e6   :  { %1396 = vrot.lane.b32.xlu1 %v2810_v51, %s2868_s15 }
0x16e7   :  { %v2812_v54 = vpop.eup %2811 }
0x16e8   :  { %v1390_v55 = vadd.f32 1.0, %v2812_v54 }
0x16ea   :  { %2813 = vrcp.f32 %v1390_v55 }
0x16f4   :  { %v2814_v56 = vpop.eup %2813 }
0x16f5   :  { %v1394_v60 = vmul.f32 %v2814_v56, %v1301_v25 }
0x16fd   :  { %v1032_v52 = vpop.permute.xlu0 %1031 }
0x16fe   :  { %1034 = vst.msk [vmem:[#allocation3 + $0x38] sm:$0xff] %vm206_vm3, %v1032_v52  ;;  %1035 = vst.msk [vmem:[%s3391_s12] sm:$0xff] %vm206_vm3, %v1032_v52 }
0x1705   :  { %v1057_v53 = vld [vmem:[#allocation3 + $0x38] sm:$0xff] }
0x1706   :  { %2507 = vmatmul.mubr.msk.f32.gmra.mrb[16].mxu0 %vm206_vm3, %v1057_v53 }
0x1707   :  { %2539 = vmatprep.mubr.msk.f32.mxu0 %vm2866_vm2, %v2867_v14 }
0x1758   :  { %v1397_v58 = vpop.permute.xlu1 %1396 }
0x1759   :  { %v1399_v17 = vmul.f32 %v2814_v56, %v1397_v58 }
0x175b   :  { %1401 = vrot.lane.b32.xlu1 %v1399_v17, %s2868_s15 }
0x17cd   :  { %v1402_v61 = vpop.permute.xlu1 %1401 }
0x17ce   :  { %v1404_v62 = vadd.f32 %v1402_v61, %v1394_v60 }
0x17d0   :  { %2815 = vtanh.f32 %v1404_v62 }
0x17d9   :  { %v3231_v63 = vpop.f32.mrb[16].mxu0 }
0x17da   :  { %v2816_v0 = vpop.eup %2815  ;;  %v3233_v1 = vpop.f32.mrb[17].mxu0 }
0x17db   :  { %1407 = vrot.lane.b32.xlu1 %v2816_v0, %s2868_s15 }
0x184d   :  { %v1408_v2 = vpop.permute.xlu1 %1407 }
0x184e   :  { %v1410_v3 = vmul.f32 %v2814_v56, %v1408_v2 }
0x1850   :  { %1412 = vrot.lane.b32.xlu1 %v1410_v3, %s2869_s5 }
0x18c2   :  { %v1413_v6 = vpop.permute.xlu1 %1412 }
0x18c3   :  { %1415 = vst.msk [vmem:[#allocation3 + $0x8] sm:$0xff] %vm206_vm3, %v1413_v6  ;;  %2540 = vmatmul.mubr.msk.f32.vlgmr.msra.gmra.mrb[18].mxu0 %vm206_vm3, %v1413_v6  ;;  %v1180_v6 = vadd.f32 %v3138_v44, %v3196_v5 }
0x18c4   :  { %2699 = vmatpush3.bf16.msra.mxu0 %v3153_v57  ;;  %2561 = vmatprep.mubr.msk.f32.mxu0 %vm2866_vm2, %v2867_v14 }
0x18c5   :  { %2700 = vmatprep.subr.bf16.mxu0 %v2865_v8 }
0x18c8   :  { %2702 = vmatpush3.bf16.msra.mxu0 %v3163_v59 }
0x18c9   :  { %2709 = vmatprep.subr.bf16.mxu0 %v2865_v8 }
0x1996   :  { %v1485_v7 = vpop.f32.mrb[18].mxu0 }
0x1997   :  { %v1489_v9 = vadd.f32 %v1485_v7, %v1165_v4  ;;  %v2541_v13 = vpop.f32.mrb[19].mxu0 }
0x1999   :  { %2817 = vtanh.f32 %v1489_v9  ;;  %v2252_v11 = vmul.f32 -1.442695, %v1489_v9 }
0x199b   :  { %2819 = vpow2.f32 %v2252_v11 }
0x19a3   :  { %v2818_v10 = vpop.eup %2817 }
0x19a4   :  { %1499 = vrot.lane.b32.xlu0 %v2818_v10, %s2868_s15 }
0x19a5   :  { %v2820_v16 = vpop.eup %2819 }
0x19a6   :  { %v1493_v19 = vadd.f32 1.0, %v2820_v16 }
0x19a8   :  { %2821 = vrcp.f32 %v1493_v19 }
0x19b2   :  { %v2822_v20 = vpop.eup %2821 }
0x19b3   :  { %v1497_v18 = vmul.f32 %v2822_v20, %v1404_v62 }
0x1a16   :  { %v1500_v12 = vpop.permute.xlu0 %1499 }
0x1a17   :  { %v1502_v15 = vmul.f32 %v2822_v20, %v1500_v12  ;;  %v2051_v12 = vld [vmem:[%s3392_s9 + $0x8] sm:$0xff] }
0x1a19   :  { %1504 = vrot.lane.b32.xlu1 %v1502_v15, %s2868_s15 }
0x1a8b   :  { %v1505_v21 = vpop.permute.xlu1 %1504 }
0x1a8c   :  { %v1507_v43 = vadd.f32 %v1505_v21, %v1497_v18 }
0x1a8e   :  { %2823 = vtanh.f32 %v1507_v43 }
0x1a98   :  { %v2824_v23 = vpop.eup %2823 }
0x1a99   :  { %1510 = vrot.lane.b32.xlu0 %v2824_v23, %s2868_s15  ;;  %v2052_v23 = vld [vmem:[%s3392_s9 + $0x10] sm:$0xff] }
0x1b0b   :  { %v1511_v24 = vpop.permute.xlu0 %1510 }
0x1b0c   :  { %v1513_v25 = vmul.f32 %v2822_v20, %v1511_v24  ;;  %v2050_v20 = vld [vmem:[%s3392_s9] sm:$0xff]  ;;  %v2053_v24 = vld [vmem:[%s3392_s9 + $0x18] sm:$0xff] }
0x1b0d   :  { %v2721_v15 = vpack.c.bf16 %v2051_v12, %v2050_v20 }
0x1b0e   :  { %1515 = vrot.lane.b32.xlu1 %v1513_v25, %s2869_s5  ;;  %v2725_v25 = vpack.c.bf16 %v2053_v24, %v2052_v23 }
0x1b80   :  { %v1516_v26 = vpop.permute.xlu1 %1515 }
0x1b81   :  { %1518 = vst.msk [vmem:[#allocation3 + $0x10] sm:$0xff] %vm206_vm3, %v1516_v26  ;;  %2551 = vmatmul.mubr.msk.f32.vlgmr.msra.gmra.mrb[18].mxu1 %vm206_vm3, %v1516_v26 }
0x1b82   :  { %2705 = vmatpush3.bf16.msra.mxu1 %v3153_v57  ;;  %2572 = vmatprep.mubr.msk.f32.mxu1 %vm2866_vm2, %v2867_v14 }
0x1b83   :  { %2706 = vmatprep.subr.bf16.mxu1 %v2865_v8 }
0x1b86   :  { %2708 = vmatpush3.bf16.msra.mxu1 %v3163_v59 }
0x1b87   :  { %2715 = vmatprep.subr.bf16.mxu1 %v2865_v8 }
0x1c54   :  { %v1588_v28 = vpop.f32.mrb[18].mxu1 }
0x1c55   :  { %v1592_v29 = vadd.f32 %v1588_v28, %v1170_v27  ;;  %v2552_v30 = vpop.f32.mrb[19].mxu1  ;;  %v2042_v27 = vld [vmem:[#allocation3] sm:$0xff]  ;;  %v2043_v28 = vld [vmem:[#allocation3 + $0x8] sm:$0xff] }
0x1c57   :  { %2825 = vtanh.f32 %v1592_v29  ;;  %v2254_v32 = vmul.f32 -1.442695, %v1592_v29  ;;  %v2044_v29 = vld [vmem:[#allocation3 + $0x10] sm:$0xff] }
0x1c59   :  { %2827 = vpow2.f32 %v2254_v32 }
0x1c61   :  { %v2826_v31 = vpop.eup %2825 }
0x1c62   :  { %1602 = vrot.lane.b32.xlu0 %v2826_v31, %s2868_s15 }
0x1c63   :  { %v2828_v33 = vpop.eup %2827 }
0x1c64   :  { %v1596_v34 = vadd.f32 1.0, %v2828_v33  ;;  %v1185_v33 = vadd.f32 %v3196_v5, %v3233_v1 }
0x1c66   :  { %2829 = vrcp.f32 %v1596_v34 }
0x1c70   :  { %v2830_v35 = vpop.eup %2829 }
0x1c71   :  { %v1600_v38 = vmul.f32 %v2830_v35, %v1507_v43 }
0x1cd4   :  { %v1603_v36 = vpop.permute.xlu0 %1602 }
0x1cd5   :  { %v1605_v37 = vmul.f32 %v2830_v35, %v1603_v36 }
0x1cd7   :  { %1607 = vrot.lane.b32.xlu1 %v1605_v37, %s2868_s15  ;;  %v3319_v37 = vld [vmem:[%s3393_s10] ss:$0 sm:$0xff] }
0x1d49   :  { %v1608_v42 = vpop.permute.xlu1 %1607 }
0x1d4a   :  { %v1610_v41 = vadd.f32 %v1608_v42, %v1600_v38 }
0x1d4c   :  { %2831 = vtanh.f32 %v1610_v41 }
0x1d56   :  { %v2832_v46 = vpop.eup %2831 }
0x1d57   :  { %1613 = vrot.lane.b32.xlu0 %v2832_v46, %s2868_s15 }
0x1dc9   :  { %v1614_v22 = vpop.permute.xlu0 %1613 }
0x1dca   :  { %v1616_v47 = vmul.f32 %v2830_v35, %v1614_v22 }
0x1dcc   :  { %1618 = vrot.lane.b32.xlu1 %v1616_v47, %s2869_s5 }
0x1e3e   :  { %v1619_v48 = vpop.permute.xlu1 %1618 }
0x1e3f   :  { %1621 = vst.msk [vmem:[#allocation3 + $0x18] sm:$0xff] %vm206_vm3, %v1619_v48  ;;  %2562 = vmatmul.mubr.msk.f32.vlgmr.msra.gmra.mrb[20].mxu0 %vm206_vm3, %v1619_v48 }
0x1e40   :  { %2711 = vmatpush3.bf16.msra.mxu0 %v3153_v57  ;;  %2583 = vmatprep.mubr.msk.f32.mxu0 %vm2866_vm2, %v2867_v14 }
0x1e41   :  { %2712 = vmatprep.subr.bf16.mxu0 %v2865_v8 }
0x1e44   :  { %2714 = vmatpush3.bf16.msra.mxu0 %v3163_v59 }
0x1e45   :  { %2722 = vmatprep.subr.bf16.mxu0 %v2721_v15 }
0x1e46   :  { %v2045_v30 = vld [vmem:[#allocation3 + $0x18] sm:$0xff] }
0x1f12   :  { %v1691_v50 = vpop.f32.mrb[20].mxu0 }
0x1f13   :  { %v1695_v51 = vadd.f32 %v1691_v50, %v1175_v49  ;;  %v2563_v52 = vpop.f32.mrb[21].mxu0 }
0x1f15   :  { %2833 = vtanh.f32 %v1695_v51  ;;  %v2256_v39 = vmul.f32 -1.442695, %v1695_v51 }
0x1f17   :  { %2835 = vpow2.f32 %v2256_v39 }
0x1f1f   :  { %v2834_v53 = vpop.eup %2833 }
0x1f20   :  { %1705 = vrot.lane.b32.xlu0 %v2834_v53, %s2868_s15 }
0x1f21   :  { %v2836_v54 = vpop.eup %2835 }
0x1f22   :  { %v1699_v55 = vadd.f32 1.0, %v2836_v54 }
0x1f24   :  { %2837 = vrcp.f32 %v1699_v55 }
0x1f2e   :  { %v2838_v56 = vpop.eup %2837 }
0x1f2f   :  { %v1703_v60 = vmul.f32 %v2838_v56, %v1610_v41 }
0x1f92   :  { %v1706_v58 = vpop.permute.xlu0 %1705 }
0x1f93   :  { %v1708_v17 = vmul.f32 %v2838_v56, %v1706_v58 }
0x1f95   :  { %1710 = vrot.lane.b32.xlu1 %v1708_v17, %s2868_s15 }
0x2007   :  { %v1711_v61 = vpop.permute.xlu1 %1710 }
0x2008   :  { %v1713_v45 = vadd.f32 %v1711_v61, %v1703_v60 }
0x200a   :  { %2839 = vtanh.f32 %v1713_v45 }
0x2014   :  { %v2840_v62 = vpop.eup %2839 }
0x2015   :  { %1716 = vrot.lane.b32.xlu0 %v2840_v62, %s2868_s15 }
0x2087   :  { %v1717_v0 = vpop.permute.xlu0 %1716 }
0x2088   :  { %v1719_v2 = vmul.f32 %v2838_v56, %v1717_v0 }
0x208a   :  { %1721 = vrot.lane.b32.xlu1 %v1719_v2, %s2869_s5 }
0x20fc   :  { %v1722_v3 = vpop.permute.xlu1 %1721 }
0x20fd   :  { %1724 = vst.msk [vmem:[#allocation3 + $0x20] sm:$0xff] %vm206_vm3, %v1722_v3  ;;  %2573 = vmatmul.mubr.msk.f32.vlgmr.msra.gmra.mrb[20].mxu1 %vm206_vm3, %v1722_v3 }
0x20fe   :  { %2717 = vmatpush3.bf16.msra.mxu1 %v3153_v57  ;;  %2594 = vmatprep.mubr.msk.f32.mxu1 %vm2866_vm2, %v2867_v14 }
0x20ff   :  { %2718 = vmatprep.subr.bf16.mxu1 %v2865_v8 }
0x2102   :  { %2720 = vmatpush3.bf16.msra.mxu1 %v3163_v59 }
0x2104   :  { %v2046_v31 = vld [vmem:[#allocation3 + $0x20] sm:$0xff] }
0x21d0   :  { %v1794_v4 = vpop.f32.mrb[20].mxu1 }
0x21d1   :  { %v1798_v7 = vadd.f32 %v1794_v4, %v1180_v6  ;;  %v2574_v9 = vpop.f32.mrb[21].mxu1  ;;  %v1190_v4 = vadd.f32 %v3231_v63, %v3196_v5 }
0x21d3   :  { %2841 = vtanh.f32 %v1798_v7  ;;  %v2258_v10 = vmul.f32 -1.442695, %v1798_v7 }
0x21d5   :  { %2843 = vpow2.f32 %v2258_v10 }
0x21dd   :  { %v2842_v13 = vpop.eup %2841 }
0x21de   :  { %1808 = vrot.lane.b32.xlu0 %v2842_v13, %s2868_s15 }
0x21df   :  { %v2844_v57 = vpop.eup %2843 }
0x21e0   :  { %v1802_v11 = vadd.f32 1.0, %v2844_v57 }
0x21e2   :  { %2845 = vrcp.f32 %v1802_v11 }
0x21ec   :  { %v2846_v14 = vpop.eup %2845 }
0x21ed   :  { %v1806_v59 = vmul.f32 %v2846_v14, %v1713_v45 }
0x2250   :  { %v1809_v16 = vpop.permute.xlu0 %1808 }
0x2251   :  { %v1811_v8 = vmul.f32 %v2846_v14, %v1809_v16 }
0x2253   :  { %1813 = vrot.lane.b32.xlu1 %v1811_v8, %s2868_s15 }
0x22c5   :  { %v1814_v19 = vpop.permute.xlu1 %1813 }
0x22c6   :  { %v3289_v44 = vadd.f32 %v1814_v19, %v1806_v59 }
0x22c8   :  { %2847 = vtanh.f32 %v3289_v44 }
0x22d2   :  { %v2848_v18 = vpop.eup %2847 }
0x22d3   :  { %1819 = vrot.lane.b32.xlu0 %v2848_v18, %s2868_s15 }
0x2345   :  { %v1820_v21 = vpop.permute.xlu0 %1819 }
0x2346   :  { %v1822_v43 = vmul.f32 %v2846_v14, %v1820_v21 }
0x2348   :  { %1824 = vrot.lane.b32.xlu1 %v1822_v43, %s2869_s5 }
0x23ba   :  { %v1825_v26 = vpop.permute.xlu1 %1824 }
0x23bb   :  { %1827 = vst.msk [vmem:[#allocation3 + $0x28] sm:$0xff] %vm206_vm3, %v1825_v26  ;;  %2584 = vmatmul.mubr.msk.f32.vlgmr.msra.gmra.mrb[22].mxu0 %vm206_vm3, %v1825_v26 }
0x23bc   :  { %2724 = vmatpush3.bf16.msra.mxu0 %v2721_v15  ;;  %2605 = vmatprep.mubr.msk.f32.mxu0 %vm206_vm3, %v2042_v27 }
0x23bd   :  { %2726 = vmatprep.subr.bf16.mxu0 %v2725_v25 }
0x23c0   :  { %2728 = vmatpush3.bf16.msra.mxu0 %v2725_v25 }
0x23c2   :  { %v2047_v32 = vld [vmem:[#allocation3 + $0x28] sm:$0xff] }
0x23c3   :  { %2606 = vmatmul.mubr.msk.f32.vlgmr.msra.gmra.mrb[24].mxu0 %vm206_vm3, %v2043_v28 }
0x23c4   :  { %2608 = vmatprep.mubr.msk.f32.mxu0 %vm206_vm3, %v2044_v29 }
0x23c7   :  { %2609 = vmatmul.mubr.msk.f32.gmra.mrb[26].mxu0 %vm206_vm3, %v2045_v30 }
0x23c8   :  { %2611 = vmatprep.mubr.msk.f32.mxu0 %vm206_vm3, %v2046_v31 }
0x23cb   :  { %2612 = vmatmul.mubr.msk.f32.gmra.mrb[28].mxu0 %vm206_vm3, %v2047_v32 }
0x248e   :  { %v1897_v34 = vpop.f32.mrb[22].mxu0 }
0x248f   :  { %v1901_v35 = vadd.f32 %v1897_v34, %v1185_v33  ;;  %v2585_v36 = vpop.f32.mrb[23].mxu0 }
0x2491   :  { %2849 = vtanh.f32 %v1901_v35  ;;  %v2260_v39 = vmul.f32 -1.442695, %v1901_v35 }
0x2493   :  { %2851 = vpow2.f32 %v2260_v39 }
0x2496   :  { %v2607_v38 = vpop.f32.mrb[24].mxu0 }
0x2497   :  { %v2157_v42 = vadd.f32 %v2607_v38, %v3319_v37  ;;  %v2151_v41 = vpop.f32.mrb[25].mxu0 }
0x2498   :  { %v2152_v46 = vadd.f32 %v3319_v37, %v2151_v41 }
0x2499   :  { %2191 = vst [vmem:[%s3394_s11 + $0x8] sm:$0xff] %v2157_v42 }
0x249a   :  { %2190 = vst [vmem:[%s3394_s11] sm:$0xff] %v2152_v46  ;;  %v2610_v1 = vpop.f32.mrb[26].mxu0 }
0x249b   :  { %v2850_v22 = vpop.eup %2849  ;;  %v2167_v47 = vadd.f32 %v2610_v1, %v3319_v37  ;;  %v2161_v48 = vpop.f32.mrb[27].mxu0 }
0x249c   :  { %v2162_v49 = vadd.f32 %v3319_v37, %v2161_v48  ;;  %1911 = vrot.lane.b32.xlu0 %v2850_v22, %s2868_s15 }
0x249d   :  { %2193 = vst [vmem:[%s3394_s11 + $0x18] sm:$0xff] %v2167_v47  ;;  %v2852_v54 = vpop.eup %2851 }
0x249e   :  { %2192 = vst [vmem:[%s3394_s11 + $0x10] sm:$0xff] %v2162_v49  ;;  %v2613_v50 = vpop.f32.mrb[28].mxu0  ;;  %v1905_v55 = vadd.f32 1.0, %v2852_v54 }
0x249f   :  { %v2177_v51 = vadd.f32 %v2613_v50, %v3319_v37  ;;  %v2171_v52 = vpop.f32.mrb[29].mxu0 }
0x24a0   :  { %v2172_v53 = vadd.f32 %v3319_v37, %v2171_v52  ;;  %2853 = vrcp.f32 %v1905_v55 }
0x24a1   :  { %2195 = vst [vmem:[%s3394_s11 + $0x28] sm:$0xff] %v2177_v51 }
0x24a2   :  { %2194 = vst [vmem:[%s3394_s11 + $0x20] sm:$0xff] %v2172_v53 }
0x24aa   :  { %v2854_v56 = vpop.eup %2853 }
0x24ab   :  { %v1909_v60 = vmul.f32 %v2854_v56, %v3289_v44 }
0x250e   :  { %v1912_v58 = vpop.permute.xlu0 %1911 }
0x250f   :  { %v1914_v17 = vmul.f32 %v2854_v56, %v1912_v58 }
0x2511   :  { %1916 = vrot.lane.b32.xlu1 %v1914_v17, %s2868_s15 }
0x2583   :  { %v1917_v61 = vpop.permute.xlu1 %1916 }
0x2584   :  { %v1919_v45 = vadd.f32 %v1917_v61, %v1909_v60 }
0x2586   :  { %2855 = vtanh.f32 %v1919_v45 }
0x2590   :  { %v2856_v62 = vpop.eup %2855 }
0x2591   :  { %1922 = vrot.lane.b32.xlu0 %v2856_v62, %s2868_s15 }
0x2603   :  { %v1923_v0 = vpop.permute.xlu0 %1922 }
0x2604   :  { %v1925_v2 = vmul.f32 %v2854_v56, %v1923_v0 }
0x2606   :  { %1927 = vrot.lane.b32.xlu1 %v1925_v2, %s2869_s5 }
0x2678   :  { %v1928_v3 = vpop.permute.xlu1 %1927 }
0x2679   :  { %1930 = vst.msk [vmem:[#allocation3 + $0x30] sm:$0xff] %vm206_vm3, %v1928_v3  ;;  %2595 = vmatmul.mubr.msk.f32.vlgmr.msra.gmra.mrb[22].mxu1 %vm206_vm3, %v1928_v3 }
0x2680   :  { %v2048_v6 = vld [vmem:[#allocation3 + $0x30] sm:$0xff] }
0x2681   :  { %2614 = vmatprep.mubr.msk.f32.mxu0 %vm206_vm3, %v2048_v6 }
0x274c   :  { %v2000_v7 = vpop.f32.mrb[22].mxu1 }
0x274d   :  { %v2004_v9 = vadd.f32 %v2000_v7, %v1190_v4  ;;  %v2596_v13 = vpop.f32.mrb[23].mxu1 }
0x274f   :  { %2857 = vtanh.f32 %v2004_v9  ;;  %v2262_v57 = vmul.f32 -1.442695, %v2004_v9 }
0x2751   :  { %2859 = vpow2.f32 %v2262_v57 }
0x2759   :  { %v2858_v10 = vpop.eup %2857 }
0x275a   :  { %2014 = vrot.lane.b32.xlu0 %v2858_v10, %s2868_s15 }
0x275b   :  { %v2860_v11 = vpop.eup %2859 }
0x275c   :  { %v2008_v14 = vadd.f32 1.0, %v2860_v11 }
0x275e   :  { %2861 = vrcp.f32 %v2008_v14 }
0x2768   :  { %v2862_v16 = vpop.eup %2861 }
0x2769   :  { %v2012_v19 = vmul.f32 %v2862_v16, %v1919_v45 }
0x27cc   :  { %v2015_v8 = vpop.permute.xlu0 %2014 }
0x27cd   :  { %v2017_v59 = vmul.f32 %v2862_v16, %v2015_v8 }
0x27cf   :  { %2019 = vrot.lane.b32.xlu1 %v2017_v59, %s2868_s15 }
0x2841   :  { %v2020_v44 = vpop.permute.xlu1 %2019 }
0x2842   :  { %v2022_v5 = vadd.f32 %v2020_v44, %v2012_v19 }
0x2844   :  { %2863 = vtanh.f32 %v2022_v5 }
0x284e   :  { %v2864_v63 = vpop.eup %2863 }
0x284f   :  { %2025 = vrot.lane.b32.xlu0 %v2864_v63, %s2868_s15 }
0x2853   :  { %1037 = vrot.lane.b32.xlu0 %v3212_v40, %s2870_s1 }
0x28c1   :  { %v2026_v20 = vpop.permute.xlu0 %2025 }
0x28c2   :  { %v2028_v12 = vmul.f32 %v2862_v16, %v2026_v20 }
0x28c4   :  { %2030 = vrot.lane.b32.xlu1 %v2028_v12, %s2869_s5 }
0x28c5   :  { %v1038_v15 = vpop.permute.xlu0 %1037 }
0x28c6   :  { %1040 = vst.msk [vmem:[%s3395_s13] sm:$0xff] %vm206_vm3, %v1038_v15 }
0x28c8   :  { %2037 = vrot.lane.b32.xlu1 %v2022_v5, %s2870_s1 }
0x2936   :  { %v2031_v18 = vpop.permute.xlu1 %2030 }
0x2937   :  { %2033 = vst.msk [vmem:[#allocation3 + $0x38] sm:$0xff] %vm206_vm3, %v2031_v18  ;;  %2263 = vst.msk [vmem:[%s3391_s12 + $0x8] sm:$0xff] %vm206_vm3, %v2031_v18 }
0x293a   :  { %v2038_v40 = vpop.permute.xlu1 %2037 }
0x293b   :  { %2264 = vst.msk [vmem:[%s3395_s13 + $0x8] sm:$0xff] %vm206_vm3, %v2038_v40 }
0x293e   :  { %v2049_v21 = vld [vmem:[#allocation3 + $0x38] sm:$0xff] }
0x293f   :  { %2615 = vmatmul.mubr.msk.f32.gmra.mrb[30].mxu0 %vm206_vm3, %v2049_v21 }
0x2a12   :  { %v2616_v43 = vpop.f32.mrb[30].mxu0 }
0x2a13   :  { %v2187_v23 = vadd.f32 %v2616_v43, %v3319_v37  ;;  %v2181_v24 = vpop.f32.mrb[31].mxu0 }
0x2a14   :  { %v2182_v25 = vadd.f32 %v3319_v37, %v2181_v24 }
0x2a15   :  { %2197 = vst [vmem:[%s3394_s11 + $0x38] sm:$0xff] %v2187_v23 }
0x2a16   :  { %2196 = vst [vmem:[%s3394_s11 + $0x30] sm:$0xff] %v2182_v25 }

</bundles_post_ra>
